<compile_context>
chip_gen: v5e
topology: v5e:2x2
jax: 0.10.0
libtpu: 0.0.40
codegen_flags: <defaults>
</compile_context>

<pallas_src>
import jax
import jax.numpy as jnp
from jax.experimental import pallas as pl
from jax.experimental.pallas import tpu as pltpu


def _round_up(x, m):
    return ((x + m - 1) // m) * m


def sage_conv_kernel(adj_ref, x_k_ref, x_row_ref, wcat_ref, b_ref,
                     o_ref, acc_ref, deg_ref):
    # adj_ref   : (tm, tk)          int8 adjacency tile (0/1 values)
    # x_k_ref   : (tk, c_in)        bf16 feature rows for this K-step
    # x_row_ref : (tm, c_in)        bf16 features of this tile's nodes (root term)
    # wcat_ref  : (2*c_in, c_out_p) bf16 [weight; root_weight], zero-padded cols
    # b_ref     : (1, c_out_p)      f32 bias, zero-padded cols
    # o_ref     : (tm, c_out_p)     f32 output tile (lane-dense)
    # acc_ref   : (tm, c_in)        f32 aggregation accumulator (VMEM scratch)
    # deg_ref   : (tm, 1)           f32 degree accumulator (VMEM scratch)
    k = pl.program_id(1)

    @pl.when(k == 0)
    def _():
        acc_ref[...] = jnp.zeros_like(acc_ref)
        deg_ref[...] = jnp.zeros_like(deg_ref)

    # Upcast int8 -> bf16 in-register (0/1 exact); single-pass bf16 MXU matmul
    # with f32 accumulation.  This is the dominant HBM stream; compute hides
    # under the adj DMA.
    adj_bf = adj_ref[...].astype(jnp.bfloat16)
    acc_ref[...] += jnp.dot(adj_bf, x_k_ref[...],
                            preferred_element_type=jnp.float32)

    # In-kernel degree: exact f32 row-sum of the 0/1 tile (XLU slot, ~free).
    deg_ref[...] += jnp.sum(adj_ref[...].astype(jnp.float32),
                            axis=-1, keepdims=True)

    @pl.when(k == pl.num_programs(1) - 1)
    def _():
        inv_deg = 1.0 / jnp.maximum(deg_ref[...], 1.0)        # exact divide
        agg = (acc_ref[...] * inv_deg).astype(jnp.bfloat16)   # (tm, c_in)
        feat = jnp.concatenate([agg, x_row_ref[...]], axis=-1)  # (tm, 2*c_in)
        out = jnp.dot(feat, wcat_ref[...],
                      preferred_element_type=jnp.float32) + b_ref[...]
        o_ref[...] = out.astype(o_ref.dtype)


def sage_conv(x, adj, weight, root_weight, bias, *, tm=512, tk=512):
    """out = mean_aggregate(adj, x) @ weight + x @ root_weight + bias.

    adj must contain only 0/1 values (binary adjacency); ideally pass it
    already stored as int8 so the wrapper does not re-touch the N^2 stream.
    """
    N, c_in = x.shape
    c_out = weight.shape[1]
    assert tm % 32 == 0, "tm must be a multiple of 32 (int8 sublane packing)"
    assert tk % 128 == 0, "tk must be a multiple of 128 (lane tiling)"

    # Independent row/col padding (bounded waste < tm rows + < tk cols).
    n_rows_pad = _round_up(N, tm)
    n_cols_pad = _round_up(N, tk)
    n_x_pad = max(n_rows_pad, n_cols_pad)
    # Lane-dense output: pad out-channels only to the next multiple of 128.
    c_out_p = _round_up(c_out, 128)

    adj_i8 = adj if adj.dtype == jnp.int8 else adj.astype(jnp.int8)
    if n_rows_pad != N or n_cols_pad != N:
        adj_p = jnp.pad(adj_i8, ((0, n_rows_pad - N), (0, n_cols_pad - N)))
    else:
        adj_p = adj_i8

    x_bf = x.astype(jnp.bfloat16)
    x_p = jnp.pad(x_bf, ((0, n_x_pad - N), (0, 0))) if n_x_pad != N else x_bf

    # Fused projection weights: [weight; root_weight], zero-padded columns.
    w_cat = jnp.concatenate([weight, root_weight], axis=0).astype(jnp.bfloat16)
    w_cat_p = jnp.pad(w_cat, ((0, 0), (0, c_out_p - c_out)))
    bias_p = jnp.pad(bias.reshape(1, c_out).astype(jnp.float32),
                     ((0, 0), (0, c_out_p - c_out)))

    out_p = pl.pallas_call(
        sage_conv_kernel,
        out_shape=jax.ShapeDtypeStruct((n_rows_pad, c_out_p), jnp.float32),
        grid_spec=pltpu.PrefetchScalarGridSpec(
            num_scalar_prefetch=0,
            grid=(n_rows_pad // tm, n_cols_pad // tk),        # k (reduction) last
            in_specs=[
                pl.BlockSpec((tm, tk), lambda i, k: (i, k)),        # adj (int8)
                pl.BlockSpec((tk, c_in), lambda i, k: (k, 0)),      # x rows, K-step
                pl.BlockSpec((tm, c_in), lambda i, k: (i, 0)),      # x rows, root
                pl.BlockSpec((2 * c_in, c_out_p), lambda i, k: (0, 0)),  # [W; W_root]
                pl.BlockSpec((1, c_out_p), lambda i, k: (0, 0)),    # bias
            ],
            out_specs=pl.BlockSpec((tm, c_out_p), lambda i, k: (i, 0)),
            scratch_shapes=[pltpu.VMEM((tm, c_in), jnp.float32),    # agg acc
                            pltpu.VMEM((tm, 1), jnp.float32)],      # degree acc
        ),
        compiler_params=pltpu.CompilerParams(
            dimension_semantics=("parallel", "arbitrary"),
            # Explicit limit: per-step footprint at tm=tk=1024 is still well
            # under this, and 32 MiB is within the scoped VMEM of v5e/v6e/v7x.
            vmem_limit_bytes=32 * 1024 * 1024),
    )(adj_p, x_p, x_p, w_cat_p, bias_p)

    return out_p[:N, :c_out]


def glorot(key, shape):
    fan_in, fan_out = shape
    limit = (6.0 / (fan_in + fan_out)) ** 0.5
    return jax.random.uniform(key, shape, jnp.float32, -limit, limit)


if __name__ == "__main__":
    N, C_IN, C_OUT = 256, 64, 32

    key = jax.random.PRNGKey(0)
    k_x, k_adj, k_w, k_rw = jax.random.split(key, 4)

    x = jax.random.normal(k_x, (N, C_IN), jnp.float32)
    # Synthetic dense 0/1 adjacency, stored as int8 (stand-in for SparseTensor).
    adj = (jax.random.uniform(k_adj, (N, N)) < 0.05).astype(jnp.int8)

    weight = glorot(k_w, (C_IN, C_OUT))
    root_weight = glorot(k_rw, (C_IN, C_OUT))
    bias = jnp.zeros((C_OUT,), jnp.float32)

    # Small tiles here so the (parallel, arbitrary) 2x2 grid is exercised;
    # production default is tm=tk=512 (sweep up to 1024).
    out = sage_conv(x, adj, weight, root_weight, bias, tm=128, tk=128)
    out = jax.block_until_ready(out)

    # Reference check (plain JAX, f32).  The kernel uses bf16 MXU operands
    # (adj is exact; x / weights lose mantissa bits), hence the bf16-level
    # tolerance.
    adj_f = adj.astype(jnp.float32)
    deg = jnp.maximum(adj_f.sum(-1, keepdims=True), 1.0)
    ref = (adj_f @ x) / deg @ weight + x @ root_weight + bias
    assert out.shape == (N, C_OUT)
    assert jnp.allclose(out, ref, atol=3e-2, rtol=3e-2), float(
        jnp.max(jnp.abs(out - ref)))

    print("KERNEL_OK")
</pallas_src>

<mosaic_0001>
module attributes {stable_mosaic.version = 11 : i64} {
  func.func @sage_conv_kernel(%arg0: i32, %arg1: i32, %arg2: memref<128x128xi8, #tpu.memory_space<vmem>>, %arg3: memref<128x64xbf16, #tpu.memory_space<vmem>>, %arg4: memref<128x64xbf16, #tpu.memory_space<vmem>>, %arg5: memref<128x128xbf16, #tpu.memory_space<vmem>>, %arg6: memref<1x128xf32, #tpu.memory_space<vmem>>, %arg7: memref<128x128xf32, #tpu.memory_space<vmem>>, %arg8: memref<128x64xf32, #tpu.memory_space<vmem>>, %arg9: memref<128x1xf32, #tpu.memory_space<vmem>>) attributes {dimension_semantics = [#tpu.dimension_semantics<parallel>, #tpu.dimension_semantics<arbitrary>], iteration_bounds = array<i64: 2, 2>, scalar_prefetch = 0 : i64, scratch_operands = 2 : i64, tpu.core_type = #tpu.core_type<tc>, window_params = [{transform_indices = @transform_0, window_bounds = array<i64: 128, 128>}, {transform_indices = @transform_1, window_bounds = array<i64: 128, 64>}, {transform_indices = @transform_2, window_bounds = array<i64: 128, 64>}, {pipeline_mode = #tpu.pipeline_mode<synchronous>, transform_indices = @transform_3, window_bounds = array<i64: 128, 128>}, {pipeline_mode = #tpu.pipeline_mode<synchronous>, transform_indices = @transform_4, window_bounds = array<i64: 1, 128>}, {transform_indices = @transform_5, window_bounds = array<i64: 128, 128>}]} {
    %c0_i32 = arith.constant 0 : i32
    %0 = arith.cmpi eq, %arg1, %c0_i32 : i32
    %1 = arith.extui %0 : i1 to i32
    %c0_i32_0 = arith.constant 0 : i32
    %2 = arith.cmpi ne, %1, %c0_i32_0 : i32
    scf.if %2 {
      %cst_16 = arith.constant 0.000000e+00 : f32
      %20 = vector.broadcast %cst_16 : f32 to vector<128x64xf32>
      %c0_17 = arith.constant 0 : index
      %c0_18 = arith.constant 0 : index
      %21 = vector.load %arg8[%c0_17, %c0_18] : memref<128x64xf32, #tpu.memory_space<vmem>>, vector<128x64xf32>
      tpu.vector_store %arg8[%c0_17, %c0_18], %20 {strides = array<i32>} : memref<128x64xf32, #tpu.memory_space<vmem>>, vector<128x64xf32>,
      %cst_19 = arith.constant 0.000000e+00 : f32
      %22 = vector.broadcast %cst_19 : f32 to vector<128x1xf32>
      %c0_20 = arith.constant 0 : index
      %c0_21 = arith.constant 0 : index
      %23 = vector.load %arg9[%c0_20, %c0_21] : memref<128x1xf32, #tpu.memory_space<vmem>>, vector<128x1xf32>
      tpu.vector_store %arg9[%c0_20, %c0_21], %22 {strides = array<i32>} : memref<128x1xf32, #tpu.memory_space<vmem>>, vector<128x1xf32>,
    } else {
    }
    %c0 = arith.constant 0 : index
    %c0_1 = arith.constant 0 : index
    %3 = vector.load %arg2[%c0, %c0_1] : memref<128x128xi8, #tpu.memory_space<vmem>>, vector<128x128xi8>
    %4 = arith.sitofp %3 : vector<128x128xi8> to vector<128x128xbf16>
    %c0_2 = arith.constant 0 : index
    %c0_3 = arith.constant 0 : index
    %5 = vector.load %arg8[%c0_2, %c0_3] : memref<128x64xf32, #tpu.memory_space<vmem>>, vector<128x64xf32>
    %c0_4 = arith.constant 0 : index
    %c0_5 = arith.constant 0 : index
    %6 = vector.load %arg3[%c0_4, %c0_5] : memref<128x64xbf16, #tpu.memory_space<vmem>>, vector<128x64xbf16>
    %cst = arith.constant dense<0.000000e+00> : vector<128x64xf32>
    %7 = tpu.matmul %4, %6, %cst {dimension_numbers = #tpu.dot_dimension_numbers<[1], [0], [0], [1], [0, 0, 1, 1], [], []>} : vector<128x128xbf16>, vector<128x64xbf16>, vector<128x64xf32> -> vector<128x64xf32>
    %8 = arith.addf %5, %7 : vector<128x64xf32>
    %c0_6 = arith.constant 0 : index
    %c0_7 = arith.constant 0 : index
    %9 = vector.load %arg8[%c0_6, %c0_7] : memref<128x64xf32, #tpu.memory_space<vmem>>, vector<128x64xf32>
    tpu.vector_store %arg8[%c0_6, %c0_7], %8 {strides = array<i32>} : memref<128x64xf32, #tpu.memory_space<vmem>>, vector<128x64xf32>,
    %c0_8 = arith.constant 0 : index
    %c0_9 = arith.constant 0 : index
    %10 = vector.load %arg9[%c0_8, %c0_9] : memref<128x1xf32, #tpu.memory_space<vmem>>, vector<128x1xf32>
    %c0_10 = arith.constant 0 : index
    %c0_11 = arith.constant 0 : index
    %11 = vector.load %arg2[%c0_10, %c0_11] : memref<128x128xi8, #tpu.memory_space<vmem>>, vector<128x128xi8>
    %12 = arith.sitofp %11 : vector<128x128xi8> to vector<128x128xf32>
    %cst_12 = arith.constant dense<0.000000e+00> : vector<128xf32>
    %13 = vector.multi_reduction <add>, %12, %cst_12 [1] : vector<128x128xf32> to vector<128xf32>
    %14 = vector.shape_cast %13 : vector<128xf32> to vector<128x1xf32>
    %15 = arith.addf %10, %14 : vector<128x1xf32>
    %c0_13 = arith.constant 0 : index
    %c0_14 = arith.constant 0 : index
    %16 = vector.load %arg9[%c0_13, %c0_14] : memref<128x1xf32, #tpu.memory_space<vmem>>, vector<128x1xf32>
    tpu.vector_store %arg9[%c0_13, %c0_14], %15 {strides = array<i32>} : memref<128x1xf32, #tpu.memory_space<vmem>>, vector<128x1xf32>,
    %c1_i32 = arith.constant 1 : i32
    %17 = arith.cmpi eq, %arg1, %c1_i32 : i32
    %18 = arith.extui %17 : i1 to i32
    %c0_i32_15 = arith.constant 0 : i32
    %19 = arith.cmpi ne, %18, %c0_i32_15 : i32
    scf.if %19 {
      %c0_16 = arith.constant 0 : index
      %c0_17 = arith.constant 0 : index
      %20 = vector.load %arg9[%c0_16, %c0_17] : memref<128x1xf32, #tpu.memory_space<vmem>>, vector<128x1xf32>
      %cst_18 = arith.constant 1.000000e+00 : f32
      %21 = vector.broadcast %cst_18 : f32 to vector<128x1xf32>
      %22 = arith.maximumf %20, %21 : vector<128x1xf32>
      %cst_19 = arith.constant 1.000000e+00 : f32
      %23 = vector.broadcast %cst_19 : f32 to vector<128x1xf32>
      %24 = arith.divf %23, %22 : vector<128x1xf32>
      %c0_20 = arith.constant 0 : index
      %c0_21 = arith.constant 0 : index
      %25 = vector.load %arg8[%c0_20, %c0_21] : memref<128x64xf32, #tpu.memory_space<vmem>>, vector<128x64xf32>
      %26 = vector.broadcast %24 : vector<128x1xf32> to vector<128x64xf32>
      %27 = arith.mulf %25, %26 : vector<128x64xf32>
      %28 = arith.truncf %27 : vector<128x64xf32> to vector<128x64xbf16>
      %c0_22 = arith.constant 0 : index
      %c0_23 = arith.constant 0 : index
      %29 = vector.load %arg4[%c0_22, %c0_23] : memref<128x64xbf16, #tpu.memory_space<vmem>>, vector<128x64xbf16>
      %30 = tpu.concatenate %28, %29 in 1 : vector<128x64xbf16>, vector<128x64xbf16> -> vector<128x128xbf16>
      %c0_24 = arith.constant 0 : index
      %c0_25 = arith.constant 0 : index
      %31 = vector.load %arg5[%c0_24, %c0_25] : memref<128x128xbf16, #tpu.memory_space<vmem>>, vector<128x128xbf16>
      %cst_26 = arith.constant dense<0.000000e+00> : vector<128x128xf32>
      %32 = tpu.matmul %30, %31, %cst_26 {dimension_numbers = #tpu.dot_dimension_numbers<[1], [0], [0], [1], [0, 0, 1, 1], [], []>} : vector<128x128xbf16>, vector<128x128xbf16>, vector<128x128xf32> -> vector<128x128xf32>
      %c0_27 = arith.constant 0 : index
      %c0_28 = arith.constant 0 : index
      %33 = vector.load %arg6[%c0_27, %c0_28] : memref<1x128xf32, #tpu.memory_space<vmem>>, vector<1x128xf32>
      %34 = vector.broadcast %33 : vector<1x128xf32> to vector<128x128xf32>
      %35 = arith.addf %32, %34 : vector<128x128xf32>
      %c0_29 = arith.constant 0 : index
      %c0_30 = arith.constant 0 : index
      %36 = vector.load %arg7[%c0_29, %c0_30] : memref<128x128xf32, #tpu.memory_space<vmem>>, vector<128x128xf32>
      tpu.vector_store %arg7[%c0_29, %c0_30], %35 {strides = array<i32>} : memref<128x128xf32, #tpu.memory_space<vmem>>, vector<128x128xf32>,
    } else {
    }
    return
  }
  func.func @transform_0(%arg0: i32, %arg1: i32) -> (i32, i32) {
    %c0_i32 = arith.constant 0 : i32
    return %arg0, %arg1 : i32, i32
  }
  func.func @transform_1(%arg0: i32, %arg1: i32) -> (i32, i32) {
    %c0_i32 = arith.constant 0 : i32
    %c0_i32_0 = arith.constant 0 : i32
    return %arg1, %c0_i32 : i32, i32
  }
  func.func @transform_2(%arg0: i32, %arg1: i32) -> (i32, i32) {
    %c0_i32 = arith.constant 0 : i32
    %c0_i32_0 = arith.constant 0 : i32
    return %arg0, %c0_i32 : i32, i32
  }
  func.func @transform_3(%arg0: i32, %arg1: i32) -> (i32, i32) {
    %c0_i32 = arith.constant 0 : i32
    %c0_i32_0 = arith.constant 0 : i32
    %c0_i32_1 = arith.constant 0 : i32
    return %c0_i32, %c0_i32_0 : i32, i32
  }
  func.func @transform_4(%arg0: i32, %arg1: i32) -> (i32, i32) {
    %c0_i32 = arith.constant 0 : i32
    %c0_i32_0 = arith.constant 0 : i32
    %c0_i32_1 = arith.constant 0 : i32
    return %c0_i32, %c0_i32_0 : i32, i32
  }
  func.func @transform_5(%arg0: i32, %arg1: i32) -> (i32, i32) {
    %c0_i32 = arith.constant 0 : i32
    %c0_i32_0 = arith.constant 0 : i32
    return %arg0, %c0_i32 : i32, i32
  }
}

</mosaic_0001>

<bundles_post_ra>
// kernel: tpu_custom_call.1
= control target key start
LH: loop header
LB: loop body
LE: loop exit
PB: predicated region body
PF: predicated region fallthrough
CT: control target
= control target key end

     0   :  { %s2606_s0 = inlined_call_operand.vmem [shape: s8[256,256], index: 0, kind: input, shape index: {}]   ;;  %s2607_s1 = inlined_call_operand.vmem [shape: bf16[256,64], index: 1, kind: input, shape index: {}]   ;;  %s2608_s2 = inlined_call_operand.vmem [shape: bf16[256,64], index: 2, kind: input, shape index: {}]   ;;  %s2609_s3 = inlined_call_operand.vmem [shape: bf16[128,128], index: 3, kind: input, shape index: {}]   ;;  %s2610_s4 = inlined_call_operand.vmem [shape: f32[1,128], index: 4, kind: input, shape index: {}]   ;;  %s2611_s5 = inlined_call_operand.hbm [shape: f32[256,128], index: 5, kind: output, shape index: {}]  }
   0x1   :  { %2617 = sst [smem:[#allocation11_spill]] %s2606_s0 }
   0x2   :  { %10 = vsyncpa [#allocation6], 0 }
   0x3   :  { %12 = vsyncpa [#allocation6 + $0x1], 0  ;;  %s1963_s18 = smov 0   ;;  %s1965_s19 = smov 0  }
   0x4   :  { %s1967_s20 = smov 0   ;;  %s1969_s21 = smov 0  }
   0x5   :  { %s1971_s22 = smov 0   ;;  %s1973_s23 = smov 0  }
   0x6   :  { %s1975_s24 = smov 0   ;;  %s1977_s25 = smov 0  }
   0x7   :  { %s1979_s26 = smov 0   ;;  %s1981_s27 = smov 0  }
   0x8 LB: > { %2618 = sst [smem:[#allocation8_spill]] %s1922_s26  ;;  %s1496_s28 = sadd.s32 4294967295, %s1926_s27   ;;  %s1926_s27 = sphi %s1981_s27, %s18_s27   ;;  %s1922_s26 = sphi %s1979_s26, %s2682_s26   ;;  %s1918_s25 = sphi %s1977_s25, %s2689_s25   ;;  %s1914_s24 = sphi %s1975_s24, %s2680_s24   ;;  %s1910_s23 = sphi %s1973_s23, %s2688_s23   ;;  %s1906_s22 = sphi %s1971_s22, %s2687_s22   ;;  %s1902_s21 = sphi %s1969_s21, %s2686_s21   ;;  %s1898_s20 = sphi %s1967_s20, %s2685_s20   ;;  %s1894_s19 = sphi %s1965_s19, %s2684_s19   ;;  %s1890_s18 = sphi %s1963_s18, %s2683_s18  }
   0x9   : > { %s1497_s29 = sadd.s32 4294967294, %s1926_s27   ;;  %s27_s30 = sadd.s32 1, %s1918_s25 }
   0xa   : > { %s30_s6 = sadd.s32 1, %s1922_s26  ;;  %p28_p0 = scmp.ge.s32.totalorder %s27_s30, 2 }
   0xb   : > { %s39_s7 = sadd.s32 1, %s1906_s22  ;;  %p46_p1 = scmp.ne.s32.totalorder %s1906_s22, %s1902_s21 }
   0xc   : > { %p47_p2 = scmp.eq.s32.totalorder %s1926_s27, 0  ;;  %s2691_s30 = smov (%p28_p0, %s27_s30), 0 }
   0xd   : > { %2619 = sst [smem:[#allocation9_spill]] %s2691_s30  ;;  %s2693_s6 = smov (!%p28_p0, %s30_s6), %s1922_s26 }
   0xe   : > { %s35_s8 = ssub.s32 %s1918_s25, %s2691_s30  ;;  %p2026_p3 = por %p47_p2, %p46_p1 }
   0xf   : > { %p32_p4 = scmp.ge.s32.totalorder %s2693_s6, 2  ;;  %s159_s10 = sadd.s32 1, %s1898_s20 }
  0x10   : > { %p169_p5 = scmp.ne.s32.totalorder %s1898_s20, %s1894_s19  ;;  %p170_p6 = scmp.eq.s32.totalorder %s1496_s28, 3 }
  0x11   : > { %s2695_s6 = smov (%p32_p4, %s2693_s6), 0  ;;  %p175_p8 = scmp.ne.s32.totalorder %s1894_s19, %s1890_s18 }
  0x12   : > { %2621 = sst [smem:[#allocation10_spill]] %s2695_s6  ;;  %p2035_p7 = por %p170_p6, %p169_p5 }
  0x13   : > { %s34_s12 = ssub.s32 %s1922_s26, %s2695_s6  ;;  %p176_p9 = scmp.eq.s32.totalorder %s1497_s29, 3 }
  0x14   : > { %s36_s13 = sor.u32 %s35_s8, %s34_s12  ;;  %p157_p10 = scmp.eq.s32.totalorder %s34_s12, 0 }
  0x15   : > { %p37_p11 = scmp.eq.s32.totalorder %s36_s13, 0  ;;  %p2043_p12 = por %p176_p9, %p175_p8 }
  0x16   : > { %s2048_s15 = scalar_select %p157_p10, %s1898_s20, %s159_s10  }
  0x17   : > { %s2051_s16 = scalar_select %p37_p11, %s1906_s22, %s39_s7  }
  0x18   : > { %p1499_p13 = scmp.ge.s32.totalorder %s1926_s27, 4 }
  0x1a   : > { %198 = sbr.rel (%p1499_p13) target bundleno = 45 (0x2d), region = 24 }
  0x1f   : > { %201 = sbr.rel (!%p2026_p3) target bundleno = 45 (0x2d), region = 28  ;;  %s203_s17 = sand.u32 (%p2026_p3), 1, %s1906_s22  }
  0x20   : > { %s1614_s28 = sshll.u32 (%p2026_p3), %s1922_s26, 3  ;;  %s1500_s29 = sshll.u32 (%p2026_p3), %s203_s17, 5 }
  0x21   : > { %s208_s8 = sadd.s32 (%p2026_p3), %s1918_s25, %s1614_s28  ;;  %s2624_s0 = sld [smem:[#allocation11_spill]] (%p2026_p3) }
  0x22   : > { %s1503_s12 = sshll.u32 (%p2026_p3), %s208_s8, 3  ;;  %s205_s7 = scalar_lea.vmem (%p2026_p3), [#allocation4], %s1500_s29 }
  0x27   : > { %s210_s10 = scalar_lea.vmem %s2624_s0, %s1503_s12 }
  0x28   : > { %v245_v0 = vld [vmem:[%s210_s10] sm:$0xff]  ;;  %v247_v1 = vld [vmem:[%s210_s10 + $0x10] sm:$0xff] }
  0x29   : > { %v249_v2 = vld [vmem:[%s210_s10 + $0x20] sm:$0xff]  ;;  %246 = vst [vmem:[%s205_s7] sm:$0xff] %v245_v0  ;;  %v251_v3 = vld [vmem:[%s210_s10 + $0x30] sm:$0xff] }
  0x2a   : > { %248 = vst [vmem:[%s205_s7 + $0x8] sm:$0xff] %v247_v1 }
  0x2b   : > { %250 = vst [vmem:[%s205_s7 + $0x10] sm:$0xff] %v249_v2 }
  0x2c   : > { %252 = vst [vmem:[%s205_s7 + $0x18] sm:$0xff] %v251_v3 }
  0x2d PF: > { %p1504_p0 = scmp.ge.s32.totalorder %s1926_s27, 1  ;;  %p275_p1 = scmp.lt.s32.totalorder %s1926_s27, 5 }
  0x2f   : > { %p276_p2 = pnand %p1504_p0, %p275_p1 }
  0x30   : > { %s282_s6 = sand.u32 (!%p276_p2), 1, %s1902_s21   ;;  %s2615_s9 = sand.u32 (!%p276_p2), 1, %s1894_s19  }
  0x31   : > { %279 = sbr.rel (%p276_p2) target bundleno = 644 (0x284), region = 74  ;;  %s1505_s17 = sshll.u32 (!%p276_p2), %s282_s6, 5 }
  0x32   : > { %s1506_s28 = sshll.u32 (!%p276_p2), %s2615_s9, 7  ;;  %s1507_s29 = sshll.u32 (!%p276_p2), %s1910_s23, 4 }
  0x33   : > { %s1509_s8 = sshll.u32 (!%p276_p2), %s1914_s24, 4  ;;  %p321_p3 = scmp.lt.s32.totalorder (!%p276_p2), %s1507_s29, 31 }
  0x34   : > { %p327_p4 = scmp.lt.s32.totalorder (!%p276_p2), %s1509_s8, 31  ;;  %s2080_s6 = scalar_lea.vmem (!%p276_p2), [#allocation4], %s1505_s17 }
  0x35   : > { %s2082_s9 = scalar_lea.vmem (!%p276_p2), [#allocation5], %s1506_s28  ;;  %p1511_p5 = scmp.ne.s32.totalorder (!%p276_p2), %s1910_s23, 0 }
  0x36   : > { %s2697_s29 = smov (!%p321_p3, %s1507_s29), 31  ;;  %s2699_s8 = smov (!%p327_p4, %s1509_s8), 31 }
  0x37   : > { %s1508_s12 = sshll.u32 %s2697_s29, 2  ;;  %s1510_s0 = sshll.u32 %s2699_s8, 2 }
  0x38   : > { %s2073_s7 = scalar_lea.vmem %s2607_s1, %s1508_s12  ;;  %s2078_s21 = scalar_lea.vmem %s2608_s2, %s1510_s0 }
  0x39   : > { %336 = sbr.rel (%p1511_p5) target bundleno = 95 (0x5f), region = 82 }
  0x3e   : > { %vm337_vm0 = vcmask 523264   ;;  %v1928_v4 = vmov 0.0   ;;  %vm354_vm1 = vcmask 7168  }
  0x3f   : > { %338 = vst.msk [vmem:[#allocation2] sm:$0xff] %vm337_vm0, %v1928_v4 }
  0x40   : > { %339 = vst.msk [vmem:[#allocation2 + $0x8] sm:$0xff] %vm337_vm0, %v1928_v4 }
  0x41   : > { %340 = vst.msk [vmem:[#allocation2 + $0x10] sm:$0xff] %vm337_vm0, %v1928_v4 }
  0x42   : > { %341 = vst.msk [vmem:[#allocation2 + $0x18] sm:$0xff] %vm337_vm0, %v1928_v4 }
  0x43   : > { %342 = vst.msk [vmem:[#allocation2 + $0x20] sm:$0xff] %vm337_vm0, %v1928_v4 }
  0x44   : > { %343 = vst.msk [vmem:[#allocation2 + $0x28] sm:$0xff] %vm337_vm0, %v1928_v4 }
  0x45   : > { %344 = vst.msk [vmem:[#allocation2 + $0x30] sm:$0xff] %vm337_vm0, %v1928_v4 }
  0x46   : > { %345 = vst.msk [vmem:[#allocation2 + $0x38] sm:$0xff] %vm337_vm0, %v1928_v4 }
  0x47   : > { %346 = vst.msk [vmem:[#allocation2 + $0x40] sm:$0xff] %vm337_vm0, %v1928_v4 }
  0x48   : > { %347 = vst.msk [vmem:[#allocation2 + $0x48] sm:$0xff] %vm337_vm0, %v1928_v4 }
  0x49   : > { %348 = vst.msk [vmem:[#allocation2 + $0x50] sm:$0xff] %vm337_vm0, %v1928_v4 }
  0x4a   : > { %349 = vst.msk [vmem:[#allocation2 + $0x58] sm:$0xff] %vm337_vm0, %v1928_v4 }
  0x4b   : > { %350 = vst.msk [vmem:[#allocation2 + $0x60] sm:$0xff] %vm337_vm0, %v1928_v4 }
  0x4c   : > { %351 = vst.msk [vmem:[#allocation2 + $0x68] sm:$0xff] %vm337_vm0, %v1928_v4 }
  0x4d   : > { %352 = vst.msk [vmem:[#allocation2 + $0x70] sm:$0xff] %vm337_vm0, %v1928_v4 }
  0x4e   : > { %353 = vst.msk [vmem:[#allocation2 + $0x78] sm:$0xff] %vm337_vm0, %v1928_v4 }
  0x4f   : > { %355 = vst.msk [vmem:[#allocation3] sm:$0xff] %vm354_vm1, %v1928_v4 }
  0x50   : > { %356 = vst.msk [vmem:[#allocation3 + $0x8] sm:$0xff] %vm354_vm1, %v1928_v4 }
  0x51   : > { %357 = vst.msk [vmem:[#allocation3 + $0x10] sm:$0xff] %vm354_vm1, %v1928_v4 }
  0x52   : > { %358 = vst.msk [vmem:[#allocation3 + $0x18] sm:$0xff] %vm354_vm1, %v1928_v4 }
  0x53   : > { %359 = vst.msk [vmem:[#allocation3 + $0x20] sm:$0xff] %vm354_vm1, %v1928_v4 }
  0x54   : > { %360 = vst.msk [vmem:[#allocation3 + $0x28] sm:$0xff] %vm354_vm1, %v1928_v4 }
  0x55   : > { %361 = vst.msk [vmem:[#allocation3 + $0x30] sm:$0xff] %vm354_vm1, %v1928_v4 }
  0x56   : > { %362 = vst.msk [vmem:[#allocation3 + $0x38] sm:$0xff] %vm354_vm1, %v1928_v4 }
  0x57   : > { %363 = vst.msk [vmem:[#allocation3 + $0x40] sm:$0xff] %vm354_vm1, %v1928_v4 }
  0x58   : > { %364 = vst.msk [vmem:[#allocation3 + $0x48] sm:$0xff] %vm354_vm1, %v1928_v4 }
  0x59   : > { %365 = vst.msk [vmem:[#allocation3 + $0x50] sm:$0xff] %vm354_vm1, %v1928_v4 }
  0x5a   : > { %366 = vst.msk [vmem:[#allocation3 + $0x58] sm:$0xff] %vm354_vm1, %v1928_v4 }
  0x5b   : > { %367 = vst.msk [vmem:[#allocation3 + $0x60] sm:$0xff] %vm354_vm1, %v1928_v4 }
  0x5c   : > { %368 = vst.msk [vmem:[#allocation3 + $0x68] sm:$0xff] %vm354_vm1, %v1928_v4 }
  0x5d   : > { %369 = vst.msk [vmem:[#allocation3 + $0x70] sm:$0xff] %vm354_vm1, %v1928_v4 }
  0x5e   : > { %370 = vst.msk [vmem:[#allocation3 + $0x78] sm:$0xff] %vm354_vm1, %v1928_v4 }
  0x5f PF: > { %v1622_v5 = vld [vmem:[%s2073_s7 + $0x38] sm:$0xff]  ;;  %v1621_v6 = vld [vmem:[%s2073_s7 + $0x30] sm:$0xff]  ;;  %v593_v7 = vld [vmem:[%s2080_s6] sm:$0xff]  ;;  %vm677_vm2 = vcmask 7168   ;;  %vm2616_vm3 = vcmask 523264   ;;  %p1544_p6 = scmp.ne.s32.totalorder %s1910_s23, 1 }
  0x60   : > { %495 = vmatpush.bf16.msra.mxu0 %v1622_v5  ;;  %1640 = vmatpush.bf16.msra.mxu1 %v1622_v5  ;;  %v597_v8 = vunpack.c.0.s8 %v593_v7  ;;  %v372_v9 = vld [vmem:[%s2080_s6 + $0x8] sm:$0xff]  ;;  %v599_v10 = vunpack.c.2.s8 %v593_v7  ;;  %v1619_v16 = vld [vmem:[%s2073_s7 + $0x20] sm:$0xff]  ;;  %v376_v17 = vunpack.c.1.s8 %v593_v7  ;;  %v600_v19 = vunpack.c.3.s8 %v593_v7  ;;  %v1618_v20 = vld [vmem:[%s2073_s7 + $0x18] sm:$0xff]  ;;  %s1930_s0 = smov (!%p1544_p6), 64  }
  0x61   : > { %1641 = vmatpush.bf16.msra.mxu2 %v1622_v5  ;;  %1642 = vmatpush.bf16.msra.mxu3 %v1622_v5  ;;  %v379_v11 = vunpack.c.0.s8 %v372_v9  ;;  %v1620_v12 = vld [vmem:[%s2073_s7 + $0x28] sm:$0xff]  ;;  %v380_v18 = vunpack.c.1.s8 %v372_v9  ;;  %v373_v23 = vld [vmem:[%s2080_s6 + $0x10] sm:$0xff]  ;;  %v603_v27 = vunpack.c.2.s8 %v372_v9  ;;  %v374_v28 = vld [vmem:[%s2080_s6 + $0x18] sm:$0xff]  ;;  %v382_v29 = vunpack.c.3.s8 %v372_v9 }
  0x62   : > { %v2122_v13 = vcvt.s32.f32 %v597_v8  ;;  %v2126_v15 = vcvt.s32.f32 %v599_v10  ;;  %v392_v21 = vcvt.s32.f32 %v376_v17  ;;  %v2134_v24 = vcvt.s32.f32 %v600_v19  ;;  %v1617_v25 = vld [vmem:[%s2073_s7 + $0x10] sm:$0xff]  ;;  %v1616_v31 = vld [vmem:[%s2073_s7 + $0x8] sm:$0xff]  ;;  %v1615_v37 = vld [vmem:[%s2073_s7] sm:$0xff] }
  0x63   : > { %v2124_v14 = vcvt.s32.f32 %v379_v11  ;;  %v396_v22 = vcvt.s32.f32 %v380_v18  ;;  %v383_v26 = vunpack.c.0.s8 %v373_v23  ;;  %v384_v30 = vunpack.c.1.s8 %v373_v23  ;;  %v577_v57 = vld [vmem:[#allocation3] sm:$0xff]  ;;  %v579_v59 = vld [vmem:[#allocation3 + $0x10] sm:$0xff]  ;;  %v578_v2 = vld [vmem:[#allocation3 + $0x8] sm:$0xff] }
  0x64   : > { %496 = vmatpush.bf16.msra.mxu0 %v1621_v6  ;;  %1643 = vmatpush.bf16.msra.mxu1 %v1621_v6  ;;  %v387_v33 = vunpack.c.0.s8 %v374_v28  ;;  %v388_v34 = vunpack.c.1.s8 %v374_v28  ;;  %v619_v35 = vcvt.s32.f32 %v603_v27  ;;  %v398_v36 = vcvt.s32.f32 %v382_v29  ;;  %v581_v58 = vld [vmem:[#allocation3 + $0x20] sm:$0xff]  ;;  %v582_v3 = vld [vmem:[#allocation3 + $0x28] sm:$0xff]  ;;  %v580_v4 = vld [vmem:[#allocation3 + $0x18] sm:$0xff] }
  0x65   : > { %1644 = vmatpush.bf16.msra.mxu2 %v1621_v6  ;;  %1645 = vmatpush.bf16.msra.mxu3 %v1621_v6  ;;  %v399_v32 = vcvt.s32.f32 %v383_v26  ;;  %v400_v38 = vcvt.s32.f32 %v384_v30  ;;  %v386_v41 = vunpack.c.3.s8 %v373_v23  ;;  %v407_v42 = vpack.c.bf16 %v392_v21, %v2122_v13  ;;  %v583_v11 = vld [vmem:[#allocation3 + $0x30] sm:$0xff]  ;;  %v589_v29 = vld [vmem:[#allocation3 + $0x60] sm:$0xff] }
  0x66   : > { %629 = vadd.xlane.f32.xlu0 %v2122_v13  ;;  %637 = vadd.xlane.f32.xlu2 %v2124_v14  ;;  %v403_v39 = vcvt.s32.f32 %v387_v33  ;;  %v404_v40 = vcvt.s32.f32 %v388_v34  ;;  %v409_v43 = vpack.c.bf16 %v396_v22, %v2124_v14  ;;  %v385_v44 = vunpack.c.2.s8 %v373_v23  ;;  %v585_v14 = vld [vmem:[#allocation3 + $0x40] sm:$0xff]  ;;  %v588_v23 = vld [vmem:[#allocation3 + $0x58] sm:$0xff]  ;;  %v587_v26 = vld [vmem:[#allocation3 + $0x50] sm:$0xff] }
  0x67   : > { %633 = vadd.xlane.f32.xlu1 %v2126_v15  ;;  %v411_v45 = vpack.c.bf16 %v400_v38, %v399_v32  ;;  %v402_v47 = vcvt.s32.f32 %v386_v41  ;;  %v389_v49 = vunpack.c.2.s8 %v374_v28  ;;  %v390_v50 = vunpack.c.3.s8 %v374_v28  ;;  %v415_v33 = vld [vmem:[#allocation2] sm:$0xff] }
  0x68   : > { %497 = vmatpush.bf16.msra.mxu0 %v1620_v12  ;;  %1646 = vmatpush.bf16.msra.mxu1 %v1620_v12  ;;  %v413_v46 = vpack.c.bf16 %v404_v40, %v403_v39  ;;  %v401_v48 = vcvt.s32.f32 %v385_v44  ;;  %v408_v53 = vpack.c.bf16 %v2134_v24, %v2126_v15  ;;  %v410_v54 = vpack.c.bf16 %v398_v36, %v619_v35  ;;  %v584_v15 = vld [vmem:[#allocation3 + $0x38] sm:$0xff]  ;;  %v419_v34 = vld [vmem:[#allocation2 + $0x20] sm:$0xff] }
  0x69   : > { %1647 = vmatpush.bf16.msra.mxu2 %v1620_v12  ;;  %1648 = vmatpush.bf16.msra.mxu3 %v1620_v12  ;;  %v405_v51 = vcvt.s32.f32 %v389_v49  ;;  %v406_v52 = vcvt.s32.f32 %v390_v50  ;;  %v592_v44 = vld [vmem:[#allocation3 + $0x78] sm:$0xff]  ;;  %v420_v49 = vld [vmem:[#allocation2 + $0x28] sm:$0xff] }
  0x6a   : > { %v412_v55 = vpack.c.bf16 %v402_v47, %v401_v48 }
  0x6b   : > { %v414_v56 = vpack.c.bf16 %v406_v52, %v405_v51 }
  0x6c   : > { %498 = vmatpush.bf16.msra.mxu0 %v1619_v16  ;;  %1649 = vmatpush.bf16.msra.mxu1 %v1619_v16 }
  0x6d   : > { %1650 = vmatpush.bf16.msra.mxu2 %v1619_v16  ;;  %1651 = vmatpush.bf16.msra.mxu3 %v1619_v16 }
  0x6e   : > { %631 = vadd.xlane.f32.xlu0 %v392_v21  ;;  %639 = vadd.xlane.f32.xlu2 %v396_v22 }
  0x6f   : > { %635 = vadd.xlane.f32.xlu1 %v2134_v24 }
  0x70   : > { %499 = vmatpush.bf16.msra.mxu0 %v1618_v20  ;;  %1652 = vmatpush.bf16.msra.mxu1 %v1618_v20 }
  0x71   : > { %1653 = vmatpush.bf16.msra.mxu2 %v1618_v20  ;;  %1654 = vmatpush.bf16.msra.mxu3 %v1618_v20  ;;  %v586_v20 = vld [vmem:[#allocation3 + $0x48] sm:$0xff] }
  0x74   : > { %500 = vmatpush.bf16.msra.mxu0 %v1617_v25  ;;  %1655 = vmatpush.bf16.msra.mxu1 %v1617_v25 }
  0x75   : > { %1656 = vmatpush.bf16.msra.mxu2 %v1617_v25  ;;  %1657 = vmatpush.bf16.msra.mxu3 %v1617_v25 }
  0x76   : > { %641 = vadd.xlane.f32.xlu0 %v619_v35  ;;  %645 = vadd.xlane.f32.xlu2 %v399_v32  ;;  %v591_v32 = vld [vmem:[#allocation3 + $0x70] sm:$0xff] }
  0x77   : > { %643 = vadd.xlane.f32.xlu1 %v398_v36 }
  0x78   : > { %501 = vmatpush.bf16.msra.mxu0 %v1616_v31  ;;  %1658 = vmatpush.bf16.msra.mxu1 %v1616_v31 }
  0x79   : > { %1659 = vmatpush.bf16.msra.mxu2 %v1616_v31  ;;  %1660 = vmatpush.bf16.msra.mxu3 %v1616_v31 }
  0x7c   : > { %502 = vmatpush.bf16.msra.mxu0 %v1615_v37  ;;  %1661 = vmatpush.bf16.msra.mxu1 %v1615_v37 }
  0x7d   : > { %1662 = vmatpush.bf16.msra.mxu2 %v1615_v37  ;;  %1663 = vmatpush.bf16.msra.mxu3 %v1615_v37  ;;  %v590_v37 = vld [vmem:[#allocation3 + $0x68] sm:$0xff] }
  0x7e   : > { %647 = vadd.xlane.f32.xlu0 %v400_v38  ;;  %651 = vadd.xlane.f32.xlu2 %v402_v47 }
  0x7f   : > { %503 = vmatmul.bf16.vlgmr.msra.gmra.mxu0 %v407_v42  ;;  %513 = vmatmul.bf16.vlgmr.msra.gmra.mxu1 %v409_v43 }
  0x80   : > { %523 = vmatmul.bf16.vlgmr.msra.gmra.mxu2 %v411_v45  ;;  %533 = vmatmul.bf16.vlgmr.msra.gmra.mxu3 %v413_v46  ;;  %v423_v45 = vld [vmem:[#allocation2 + $0x40] sm:$0xff] }
  0x81   : > { %649 = vadd.xlane.f32.xlu1 %v401_v48  ;;  %v427_v46 = vld [vmem:[#allocation2 + $0x60] sm:$0xff]  ;;  %v416_v48 = vld [vmem:[#allocation2 + $0x8] sm:$0xff] }
  0x86   : > { %653 = vadd.xlane.f32.xlu0 %v403_v39  ;;  %657 = vadd.xlane.f32.xlu2 %v405_v51 }
  0x89   : > { %655 = vadd.xlane.f32.xlu1 %v404_v40 }
  0x8e   : > { %659 = vadd.xlane.f32.xlu0 %v406_v52 }
  0x8f   : > { %508 = vmatmul.bf16.gmra.mxu0 %v408_v53  ;;  %518 = vmatmul.bf16.gmra.mxu1 %v410_v54 }
  0x90   : > { %528 = vmatmul.bf16.gmra.mxu2 %v412_v55  ;;  %538 = vmatmul.bf16.gmra.mxu3 %v414_v56 }
  0xd9   : > { %v630_v60 = vpop.xlane.xlu0 %629  ;;  %v638_v61 = vpop.xlane.xlu2 %637 }
  0xda   : > { %v661_v62 = vadd.f32 %v630_v60, %v577_v57  ;;  %v665_v63 = vadd.f32 %v638_v61, %v581_v58  ;;  %v634_v0 = vpop.xlane.xlu1 %633  ;;  %v428_v60 = vld [vmem:[#allocation2 + $0x68] sm:$0xff]  ;;  %v417_v61 = vld [vmem:[#allocation2 + $0x10] sm:$0xff] }
  0xdb   : > { %v663_v1 = vadd.f32 %v634_v0, %v579_v59  ;;  %v424_v59 = vld [vmem:[#allocation2 + $0x48] sm:$0xff] }
  0xdc   : > { %678 = vst.msk [vmem:[#allocation3] sm:$0xff] %vm677_vm2, %v661_v62  ;;  %v421_v62 = vld [vmem:[#allocation2 + $0x30] sm:$0xff] }
  0xdd   : > { %682 = vst.msk [vmem:[#allocation3 + $0x20] sm:$0xff] %vm677_vm2, %v665_v63 }
  0xde   : > { %680 = vst.msk [vmem:[#allocation3 + $0x10] sm:$0xff] %vm677_vm2, %v663_v1 }
  0xe1   : > { %v632_v5 = vpop.xlane.xlu0 %631  ;;  %v640_v6 = vpop.xlane.xlu2 %639 }
  0xe2   : > { %v662_v7 = vadd.f32 %v632_v5, %v578_v2  ;;  %v666_v8 = vadd.f32 %v640_v6, %v582_v3  ;;  %v636_v9 = vpop.xlane.xlu1 %635 }
  0xe3   : > { %v664_v10 = vadd.f32 %v636_v9, %v580_v4  ;;  %v418_v9 = vld [vmem:[#allocation2 + $0x18] sm:$0xff] }
  0xe4   : > { %679 = vst.msk [vmem:[#allocation3 + $0x8] sm:$0xff] %vm677_vm2, %v662_v7  ;;  %v425_v7 = vld [vmem:[#allocation2 + $0x50] sm:$0xff] }
  0xe5   : > { %683 = vst.msk [vmem:[#allocation3 + $0x28] sm:$0xff] %vm677_vm2, %v666_v8  ;;  %v429_v8 = vld [vmem:[#allocation2 + $0x70] sm:$0xff] }
  0xe6   : > { %681 = vst.msk [vmem:[#allocation3 + $0x18] sm:$0xff] %vm677_vm2, %v664_v10  ;;  %v422_v10 = vld [vmem:[#allocation2 + $0x38] sm:$0xff] }
  0xe9   : > { %v642_v12 = vpop.xlane.xlu0 %641  ;;  %v646_v13 = vpop.xlane.xlu2 %645 }
  0xea   : > { %v667_v16 = vadd.f32 %v642_v12, %v583_v11  ;;  %v669_v17 = vadd.f32 %v646_v13, %v585_v14  ;;  %v644_v18 = vpop.xlane.xlu1 %643 }
  0xeb   : > { %v668_v19 = vadd.f32 %v644_v18, %v584_v15 }
  0xec   : > { %684 = vst.msk [vmem:[#allocation3 + $0x30] sm:$0xff] %vm677_vm2, %v667_v16 }
  0xed   : > { %686 = vst.msk [vmem:[#allocation3 + $0x40] sm:$0xff] %vm677_vm2, %v669_v17 }
  0xee   : > { %685 = vst.msk [vmem:[#allocation3 + $0x38] sm:$0xff] %vm677_vm2, %v668_v19  ;;  %v426_v19 = vld [vmem:[#allocation2 + $0x58] sm:$0xff] }
  0xf1   : > { %v648_v21 = vpop.xlane.xlu0 %647  ;;  %v652_v22 = vpop.xlane.xlu2 %651 }
  0xf2   : > { %v670_v24 = vadd.f32 %v648_v21, %v586_v20  ;;  %v672_v25 = vadd.f32 %v652_v22, %v588_v23  ;;  %v430_v20 = vld [vmem:[#allocation2 + $0x78] sm:$0xff] }
  0xf4   : > { %687 = vst.msk [vmem:[#allocation3 + $0x48] sm:$0xff] %vm677_vm2, %v670_v24  ;;  %v650_v27 = vpop.xlane.xlu1 %649 }
  0xf5   : > { %689 = vst.msk [vmem:[#allocation3 + $0x58] sm:$0xff] %vm677_vm2, %v672_v25  ;;  %v671_v28 = vadd.f32 %v650_v27, %v587_v26 }
  0xf7   : > { %688 = vst.msk [vmem:[#allocation3 + $0x50] sm:$0xff] %vm677_vm2, %v671_v28 }
  0xf9   : > { %v654_v30 = vpop.xlane.xlu0 %653  ;;  %v658_v31 = vpop.xlane.xlu2 %657 }
  0xfa   : > { %v673_v35 = vadd.f32 %v654_v30, %v589_v29  ;;  %v675_v36 = vadd.f32 %v658_v31, %v591_v32 }
  0xfc   : > { %v504_v38 = vpop.f32.mrf.mxu0  ;;  %v514_v39 = vpop.f32.mrf.mxu1  ;;  %690 = vst.msk [vmem:[#allocation3 + $0x60] sm:$0xff] %vm677_vm2, %v673_v35 }
  0xfd   : > { %v544_v40 = vadd.f32 %v504_v38, %v415_v33  ;;  %v548_v41 = vadd.f32 %v514_v39, %v419_v34  ;;  %692 = vst.msk [vmem:[#allocation3 + $0x70] sm:$0xff] %vm677_vm2, %v675_v36  ;;  %v656_v42 = vpop.xlane.xlu1 %655 }
  0xfe   : > { %v674_v43 = vadd.f32 %v656_v42, %v590_v37 }
  0xff   : > { %561 = vst.msk [vmem:[#allocation2] sm:$0xff] %vm2616_vm3, %v544_v40 }
 0x100   : > { %565 = vst.msk [vmem:[#allocation2 + $0x20] sm:$0xff] %vm2616_vm3, %v548_v41 }
 0x101   : > { %691 = vst.msk [vmem:[#allocation3 + $0x68] sm:$0xff] %vm677_vm2, %v674_v43  ;;  %v660_v47 = vpop.xlane.xlu0 %659 }
 0x102   : > { %v676_v50 = vadd.f32 %v660_v47, %v592_v44 }
 0x103   : > { %v524_v51 = vpop.f32.mrf.mxu2  ;;  %v534_v52 = vpop.f32.mrf.mxu3 }
 0x104   : > { %v552_v53 = vadd.f32 %v524_v51, %v423_v45  ;;  %v556_v54 = vadd.f32 %v534_v52, %v427_v46  ;;  %v506_v55 = vpop.f32.mrf.mxu0  ;;  %v516_v56 = vpop.f32.mrf.mxu1  ;;  %693 = vst.msk [vmem:[#allocation3 + $0x78] sm:$0xff] %vm677_vm2, %v676_v50 }
 0x105   : > { %v545_v57 = vadd.f32 %v506_v55, %v416_v48  ;;  %v549_v58 = vadd.f32 %v516_v56, %v420_v49 }
 0x106   : > { %569 = vst.msk [vmem:[#allocation2 + $0x40] sm:$0xff] %vm2616_vm3, %v552_v53 }
 0x107   : > { %573 = vst.msk [vmem:[#allocation2 + $0x60] sm:$0xff] %vm2616_vm3, %v556_v54 }
 0x108   : > { %562 = vst.msk [vmem:[#allocation2 + $0x8] sm:$0xff] %vm2616_vm3, %v545_v57 }
 0x109   : > { %566 = vst.msk [vmem:[#allocation2 + $0x28] sm:$0xff] %vm2616_vm3, %v549_v58 }
 0x10b   : > { %v526_v63 = vpop.f32.mrf.mxu2  ;;  %v536_v0 = vpop.f32.mrf.mxu3 }
 0x10c   : > { %v553_v1 = vadd.f32 %v526_v63, %v424_v59  ;;  %v557_v2 = vadd.f32 %v536_v0, %v428_v60  ;;  %v509_v3 = vpop.f32.mrf.mxu0  ;;  %v519_v4 = vpop.f32.mrf.mxu1 }
 0x10d   : > { %v546_v5 = vadd.f32 %v509_v3, %v417_v61  ;;  %v550_v6 = vadd.f32 %v519_v4, %v421_v62 }
 0x10e   : > { %570 = vst.msk [vmem:[#allocation2 + $0x48] sm:$0xff] %vm2616_vm3, %v553_v1 }
 0x10f   : > { %574 = vst.msk [vmem:[#allocation2 + $0x68] sm:$0xff] %vm2616_vm3, %v557_v2 }
 0x110   : > { %563 = vst.msk [vmem:[#allocation2 + $0x10] sm:$0xff] %vm2616_vm3, %v546_v5 }
 0x111   : > { %567 = vst.msk [vmem:[#allocation2 + $0x30] sm:$0xff] %vm2616_vm3, %v550_v6 }
 0x113   : > { %v529_v11 = vpop.f32.mrf.mxu2  ;;  %v539_v12 = vpop.f32.mrf.mxu3 }
 0x114   : > { %v554_v13 = vadd.f32 %v529_v11, %v425_v7  ;;  %v558_v14 = vadd.f32 %v539_v12, %v429_v8  ;;  %v511_v15 = vpop.f32.mrf.mxu0  ;;  %v521_v16 = vpop.f32.mrf.mxu1 }
 0x115   : > { %v547_v17 = vadd.f32 %v511_v15, %v418_v9  ;;  %v551_v18 = vadd.f32 %v521_v16, %v422_v10 }
 0x116   : > { %571 = vst.msk [vmem:[#allocation2 + $0x50] sm:$0xff] %vm2616_vm3, %v554_v13 }
 0x117   : > { %575 = vst.msk [vmem:[#allocation2 + $0x70] sm:$0xff] %vm2616_vm3, %v558_v14 }
 0x118   : > { %564 = vst.msk [vmem:[#allocation2 + $0x18] sm:$0xff] %vm2616_vm3, %v547_v17 }
 0x119   : > { %568 = vst.msk [vmem:[#allocation2 + $0x38] sm:$0xff] %vm2616_vm3, %v551_v18 }
 0x11b   : > { %v531_v21 = vpop.f32.mrf.mxu2  ;;  %v541_v22 = vpop.f32.mrf.mxu3  ;;  %697 = sbr.rel (%p1544_p6) target bundleno = 628 (0x274), region = 86 }
 0x11c   : > { %v555_v23 = vadd.f32 %v531_v21, %v426_v19  ;;  %v559_v24 = vadd.f32 %v541_v22, %v430_v20 }
 0x11e   : > { %572 = vst.msk [vmem:[#allocation2 + $0x58] sm:$0xff] %vm2616_vm3, %v555_v23 }
 0x11f   : > { %576 = vst.msk [vmem:[#allocation2 + $0x78] sm:$0xff] %vm2616_vm3, %v559_v24 }
 0x120   : > { %v1627_v25 = vld [vmem:[%s2078_s21 + $0x20] sm:$0xff]  ;;  %v1929_v28 = vmov 0   ;;  %v711_v32 = vld [vmem:[#allocation3 + $0x68] sm:$0xff]  ;;  %v713_v7 = vld [vmem:[#allocation3 + $0x78] sm:$0xff] }
 0x121   : > { %v710_v26 = vld [vmem:[#allocation3 + $0x60] sm:$0xff]  ;;  %1781 = vset.pattern.permute.xlu1 %v1929_v28  ;;  %1780 = vset.pattern.permute.xlu0 %v1929_v28  ;;  %v707_v33 = vld [vmem:[#allocation3 + $0x48] sm:$0xff]  ;;  %v2184_v35 = vmax.f32 %v711_v32, 1.0  ;;  %v2358_v18 = vmax.f32 %v713_v7, 1.0 }
 0x122   : > { %v706_v27 = vld [vmem:[#allocation3 + $0x40] sm:$0xff]  ;;  %v726_v29 = vmax.f32 %v710_v26, 1.0  ;;  %1202 = vrot.lane.b32.xlu2 %v1627_v25, %s1930_s0  ;;  %v2187_v38 = vmax.f32 %v707_v33, 1.0  ;;  %v699_v44 = vld [vmem:[#allocation3 + $0x8] sm:$0xff] }
 0x123   : > { %v2179_v30 = vmax.f32 %v706_v27, 1.0  ;;  %v698_v31 = vld [vmem:[#allocation3] sm:$0xff]  ;;  %1782 = vset.pattern.permute.xlu2 %v1929_v28  ;;  %v936_v43 = vand.u32 2147483648, %v2184_v35  ;;  %vm930_vm9 = vweird.f32 %v2184_v35  ;;  %v934_v50 = vand.u32 2147483647, %v2184_v35  ;;  %v703_v56 = vld [vmem:[#allocation3 + $0x28] sm:$0xff] }
 0x124   : > { %v2182_v34 = vmax.f32 %v698_v31, 1.0  ;;  %1784 = vrcp.f32 %v726_v29  ;;  %v919_v36 = vand.u32 2147483647, %v726_v29  ;;  %v921_v37 = vand.u32 2147483648, %v726_v29  ;;  %v712_v31 = vld [vmem:[#allocation3 + $0x70] sm:$0xff] }
 0x125   : > { %1786 = vrcp.f32 %v2179_v30  ;;  %v859_v39 = vand.u32 2147483647, %v2179_v30  ;;  %v861_v40 = vand.u32 2147483648, %v2179_v30  ;;  %vm915_vm4 = vweird.f32 %v726_v29 }
 0x126   : > { %1788 = vrcp.f32 %v2182_v34  ;;  %v739_v41 = vand.u32 2147483647, %v2182_v34  ;;  %v741_v42 = vand.u32 2147483648, %v2182_v34  ;;  %vm855_vm5 = vweird.f32 %v2179_v30 }
 0x127   : > { %1790 = vrcp.f32 %v2184_v35  ;;  %vm2197_vm6 = vcmp.eq.f32.partialorder %v919_v36, 8.507059e+37  ;;  %v922_v46 = vor.u32 1.1754944e-38, %v921_v37  ;;  %vm735_vm7 = vweird.f32 %v2182_v34 }
 0x128   : > { %1792 = vrcp.f32 %v2187_v38  ;;  %vm2203_vm8 = vcmp.eq.f32.partialorder %v859_v39, 8.507059e+37  ;;  %v862_v49 = vor.u32 1.1754944e-38, %v861_v40  ;;  %vm2209_vm10 = vcmp.eq.f32.partialorder %v739_v41, 8.507059e+37  ;;  %v709_v40 = vld [vmem:[#allocation3 + $0x58] sm:$0xff] }
 0x129   : > { %v742_v54 = vor.u32 1.1754944e-38, %v741_v42  ;;  %v2213_v55 = vmax.f32 %v699_v44, 1.0  ;;  %v2216_v59 = vor.u32 1.1754944e-38, %v936_v43  ;;  %vm870_vm11 = vweird.f32 %v2187_v38 }
 0x12a   : > { %v1785_v47 = vpop.eup %1784  ;;  %v874_v60 = vand.u32 2147483647, %v2187_v38  ;;  %v876_v1 = vand.u32 2147483648, %v2187_v38  ;;  %v2225_v2 = vmax.f32 %v703_v56, 1.0  ;;  %vm2231_vm15 = vcmp.eq.f32.partialorder %v934_v50, 8.507059e+37 }
 0x12b   : > { %v1787_v51 = vpop.eup %1786  ;;  %v911_v52 = vmul.f32 %v1785_v47, %v726_v29  ;;  %vm916_vm12 = vweird.f32 %v1785_v47  ;;  %1794 = vrcp.f32 %v2213_v55  ;;  %v754_v12 = vand.u32 2147483647, %v2213_v55 }
 0x12c   : > { %v1789_v57 = vpop.eup %1788  ;;  %v851_v58 = vmul.f32 %v1787_v51, %v2179_v30  ;;  %vm856_vm13 = vweird.f32 %v1787_v51  ;;  %vm2236_vm0 = vmor %vm915_vm4, %vm916_vm12  ;;  %vm2242_vm1 = vcmp.eq.f32.partialorder %v874_v60, 8.507059e+37  ;;  %1796 = vrcp.f32 %v2225_v2  ;;  %v702_v30 = vld [vmem:[#allocation3 + $0x20] sm:$0xff]  ;;  %v708_v60 = vld [vmem:[#allocation3 + $0x50] sm:$0xff] }
 0x12d   : > { %v912_v61 = vsub.f32 1.0, %v911_v52  ;;  %v731_v62 = vmul.f32 %v1789_v57, %v2182_v34  ;;  %v2222_v63 = vpop.eup %1790  ;;  %vm736_vm14 = vweird.f32 %v1789_v57  ;;  %vm2250_vm2 = vmor %vm855_vm5, %vm856_vm13  ;;  %v756_v24 = vand.u32 2147483648, %v2213_v55 }
 0x12e   : > { %v852_v0 = vsub.f32 1.0, %v851_v58  ;;  %v2227_v3 = vpop.eup %1792  ;;  %v926_v6 = vmul.f32 %v2222_v63, %v2184_v35  ;;  %vm931_vm4 = vweird.f32 %v2222_v63  ;;  %vm2257_vm12 = vmor %vm735_vm7, %vm736_vm14  ;;  %vm750_vm7 = vweird.f32 %v2213_v55 }
 0x12f   : > { %v913_v4 = vmul.f32 %v1785_v47, %v912_v61  ;;  %v732_v5 = vsub.f32 1.0, %v731_v62  ;;  %v866_v10 = vmul.f32 %v2227_v3, %v2187_v38  ;;  %vm871_vm3 = vweird.f32 %v2227_v3  ;;  %vm2273_vm5 = vmor %vm930_vm9, %vm931_vm4  ;;  %v701_v62 = vld [vmem:[#allocation3 + $0x18] sm:$0xff] }
 0x130   : > { %v853_v9 = vmul.f32 %v1787_v51, %v852_v0  ;;  %v927_v16 = vsub.f32 1.0, %v926_v6  ;;  %v877_v41 = vor.u32 1.1754944e-38, %v876_v1  ;;  %v2299_v42 = vmax.f32 %v702_v30, 1.0  ;;  %v704_v30 = vld [vmem:[#allocation3 + $0x30] sm:$0xff] }
 0x131   : > { %v914_v13 = vadd.f32 %v1785_v47, %v913_v4  ;;  %v733_v15 = vmul.f32 %v1789_v57, %v732_v5  ;;  %v867_v19 = vsub.f32 1.0, %v866_v10  ;;  %v1795_v20 = vpop.eup %1794  ;;  %v2301_v43 = vmax.f32 %v712_v31, 1.0 }
 0x132   : > { %v854_v17 = vadd.f32 %v1787_v51, %v853_v9  ;;  %v928_v23 = vmul.f32 %v2222_v63, %v927_v16  ;;  %v746_v29 = vmul.f32 %v1795_v20, %v2213_v55  ;;  %v1797_v44 = vpop.eup %1796  ;;  %v757_v48 = vor.u32 1.1754944e-38, %v756_v24  ;;  %v1625_v16 = vld [vmem:[%s2078_s21 + $0x10] sm:$0xff] }
 0x133   : > { %v918_v21 = vsel %vm2236_vm0, %v1785_v47, %v914_v13  ;;  %v734_v22 = vadd.f32 %v1789_v57, %v733_v15  ;;  %v868_v28 = vmul.f32 %v2227_v3, %v867_v19  ;;  %v806_v50 = vmul.f32 %v1797_v44, %v2225_v2  ;;  %v700_v24 = vld [vmem:[#allocation3 + $0x10] sm:$0xff] }
 0x134   : > { %v923_v25 = vsel %vm2197_vm6, %v922_v46, %v918_v21  ;;  %v858_v26 = vsel %vm2250_vm2, %v1787_v51, %v854_v17  ;;  %v929_v34 = vadd.f32 %v2222_v63, %v928_v23  ;;  %vm2288_vm6 = vmor %vm870_vm11, %vm871_vm3  ;;  %v747_v39 = vsub.f32 1.0, %v746_v29 }
 0x135   : > { %1048 = vperm.xlu1 %1781, %v923_v25   ;;  %v863_v32 = vsel %vm2203_vm8, %v862_v49, %v858_v26  ;;  %v738_v33 = vsel %vm2257_vm12, %v1789_v57, %v734_v22  ;;  %v869_v37 = vadd.f32 %v2227_v3, %v868_v28  ;;  %vm751_vm8 = vweird.f32 %v1795_v20 }
 0x136   : > { %1028 = vperm.xlu0 %1780, %v863_v32   ;;  %v743_v36 = vsel %vm2209_vm10, %v742_v54, %v738_v33  ;;  %v933_v38 = vsel %vm2273_vm5, %v2222_v63, %v929_v34  ;;  %v748_v46 = vmul.f32 %v1795_v20, %v747_v39  ;;  %vm2306_vm3 = vcmp.eq.f32.partialorder %v754_v12, 8.507059e+37  ;;  %vm2312_vm9 = vmor %vm750_vm7, %vm751_vm8 }
 0x137   : > { %988 = vperm.xlu2 %1782, %v743_v36   ;;  %v873_v45 = vsel %vm2288_vm6, %v2227_v3, %v869_v37  ;;  %vm810_vm10 = vweird.f32 %v2225_v2  ;;  %v814_v51 = vand.u32 2147483647, %v2225_v2  ;;  %v2319_v52 = vmax.f32 %v709_v40, 1.0 }
 0x138   : > { %v938_v53 = vsel %vm2231_vm15, %v2216_v59, %v933_v38  ;;  %v749_v54 = vadd.f32 %v1795_v20, %v748_v46  ;;  %v816_v56 = vand.u32 2147483648, %v2225_v2  ;;  %1798 = vrcp.f32 %v2299_v42  ;;  %v1623_v38 = vld [vmem:[%s2078_s21] sm:$0xff] }
 0x139   : > { %v878_v55 = vsel %vm2242_vm1, %v877_v41, %v873_v45  ;;  %v807_v57 = vsub.f32 1.0, %v806_v50  ;;  %vm811_vm11 = vweird.f32 %v1797_v44  ;;  %1800 = vrcp.f32 %v2301_v43 }
 0x13a   : > { %v753_v58 = vsel %vm2312_vm9, %v1795_v20, %v749_v54  ;;  %1802 = vrcp.f32 %v2319_v52  ;;  %vm2336_vm13 = vmor %vm810_vm10, %vm811_vm11  ;;  %v817_v0 = vor.u32 1.1754944e-38, %v816_v56  ;;  %vm815_vm14 = vcmp.eq.f32.partialorder %v814_v51, 8.507059e+37 }
 0x13b   : > { %v758_v59 = vsel %vm2306_vm3, %v757_v48, %v753_v58  ;;  %v808_v61 = vmul.f32 %v1797_v44, %v807_v57  ;;  %v2340_v3 = vmax.f32 %v708_v60, 1.0  ;;  %vm795_vm15 = vweird.f32 %v2299_v42 }
 0x13c   : > { %v799_v5 = vand.u32 2147483647, %v2299_v42  ;;  %v2344_v6 = vmax.f32 %v701_v62, 1.0  ;;  %v801_v10 = vand.u32 2147483648, %v2299_v42  ;;  %vm945_vm0 = vweird.f32 %v2301_v43 }
 0x13d   : > { %1053 = vperm.xlu1 %1781, %v938_v53   ;;  %v809_v1 = vadd.f32 %v1797_v44, %v808_v61  ;;  %v949_v13 = vand.u32 2147483647, %v2301_v43  ;;  %1804 = vrcp.f32 %v2340_v3  ;;  %v951_v17 = vand.u32 2147483648, %v2301_v43  ;;  %v1629_v61 = vld [vmem:[%s2078_s21 + $0x30] sm:$0xff]  ;;  %v1626_v53 = vld [vmem:[%s2078_s21 + $0x18] sm:$0xff] }
 0x13e   : > { %1033 = vperm.xlu0 %1780, %v878_v55   ;;  %v1799_v4 = vpop.eup %1798  ;;  %1806 = vrcp.f32 %v2344_v6  ;;  %vm2363_vm4 = vcmp.eq.f32.partialorder %v799_v5, 8.507059e+37  ;;  %v802_v23 = vor.u32 1.1754944e-38, %v801_v10  ;;  %v906_v29 = vand.u32 2147483648, %v2319_v52 }
 0x13f   : > { %993 = vperm.xlu2 %1782, %v758_v59   ;;  %v1801_v2 = vpop.eup %1800  ;;  %v813_v8 = vsel %vm2336_vm13, %v1797_v44, %v809_v1  ;;  %v791_v9 = vmul.f32 %v1799_v4, %v2299_v42  ;;  %vm796_vm1 = vweird.f32 %v1799_v4  ;;  %vm2373_vm5 = vcmp.eq.f32.partialorder %v949_v13, 8.507059e+37  ;;  %v705_v59 = vld [vmem:[#allocation3 + $0x38] sm:$0xff] }
 0x140   : > { %v818_v11 = vsel %vm815_vm14, %v817_v0, %v813_v8  ;;  %v941_v12 = vmul.f32 %v1801_v2, %v2301_v43  ;;  %v2354_v14 = vpop.eup %1802  ;;  %vm946_vm2 = vweird.f32 %v1801_v2  ;;  %vm2369_vm12 = vmor %vm795_vm15, %vm796_vm1  ;;  %v952_v33 = vor.u32 1.1754944e-38, %v951_v17 }
 0x141   : > { %v792_v15 = vsub.f32 1.0, %v791_v9  ;;  %v896_v20 = vmul.f32 %v2354_v14, %v2319_v52  ;;  %vm2382_vm6 = vmor %vm945_vm0, %vm946_vm2  ;;  %vm900_vm7 = vweird.f32 %v2319_v52  ;;  %1808 = vrcp.f32 %v2358_v18 }
 0x142   : > { %v942_v19 = vsub.f32 1.0, %v941_v12  ;;  %v904_v37 = vand.u32 2147483647, %v2319_v52  ;;  %v2392_v39 = vmax.f32 %v700_v24, 1.0  ;;  %vm901_vm8 = vweird.f32 %v2354_v14 }
 0x143   : > { %v793_v21 = vmul.f32 %v1799_v4, %v792_v15  ;;  %v897_v28 = vsub.f32 1.0, %v896_v20  ;;  %v2388_v34 = vpop.eup %1804  ;;  %v2400_v42 = vmax.f32 %v704_v30, 1.0  ;;  %v907_v46 = vor.u32 1.1754944e-38, %v906_v29  ;;  %vm2414_vm9 = vmor %vm900_vm7, %vm901_vm8 }
 0x144   : > { %v943_v26 = vmul.f32 %v1801_v2, %v942_v19  ;;  %v881_v41 = vmul.f32 %v2388_v34, %v2340_v3  ;;  %v1807_v43 = vpop.eup %1806  ;;  %vm885_vm3 = vweird.f32 %v2340_v3  ;;  %v889_v49 = vand.u32 2147483647, %v2340_v3 }
 0x145   : > { %1013 = vperm.xlu1 %1781, %v818_v11   ;;  %v794_v31 = vadd.f32 %v1799_v4, %v793_v21  ;;  %v898_v36 = vmul.f32 %v2354_v14, %v897_v28  ;;  %v776_v50 = vmul.f32 %v1807_v43, %v2344_v6  ;;  %vm780_vm10 = vweird.f32 %v2344_v6  ;;  %v970_v11 = vld [vmem:[#allocation2] sm:$0xff] }
 0x146   : > { %v944_v35 = vadd.f32 %v1801_v2, %v943_v26  ;;  %v882_v48 = vsub.f32 1.0, %v881_v41  ;;  %v786_v54 = vand.u32 2147483648, %v2344_v6  ;;  %1810 = vrcp.f32 %v2392_v39  ;;  %v982_v26 = vld [vmem:[#allocation2 + $0x60] sm:$0xff] }
 0x147   : > { %1198 = vrot.lane.b32.xlu2 %v1625_v16, %s1930_s0  ;;  %v798_v40 = vsel %vm2369_vm12, %v1799_v4, %v794_v31  ;;  %v899_v47 = vadd.f32 %v2354_v14, %v898_v36  ;;  %v2421_v56 = vpop.eup %1808  ;;  %v777_v57 = vsub.f32 1.0, %v776_v50  ;;  %vm781_vm11 = vweird.f32 %v1807_v43  ;;  %v1628_v36 = vld [vmem:[%s2078_s21 + $0x28] sm:$0xff] }
 0x148   : > { %v803_v44 = vsel %vm2363_vm4, %v802_v23, %v798_v40  ;;  %v948_v45 = vsel %vm2382_vm6, %v1801_v2, %v944_v35  ;;  %v883_v55 = vmul.f32 %v2388_v34, %v882_v48  ;;  %v784_v52 = vand.u32 2147483647, %v2344_v6  ;;  %vm2438_vm15 = vmor %vm780_vm10, %vm781_vm11 }
 0x149   : > { %1008 = vperm.xlu0 %1780, %v803_v44   ;;  %v953_v51 = vsel %vm2373_vm5, %v952_v33, %v948_v45  ;;  %vm886_vm13 = vweird.f32 %v2388_v34  ;;  %v891_v58 = vand.u32 2147483648, %v2340_v3  ;;  %v956_v60 = vmul.f32 %v2421_v56, %v2358_v18 }
 0x14a   : > { %1812 = vrcp.f32 %v2400_v42  ;;  %v903_v62 = vsel %vm2414_vm9, %v2354_v14, %v899_v47  ;;  %vm905_vm14 = vcmp.eq.f32.partialorder %v904_v37, 8.507059e+37  ;;  %v778_v63 = vmul.f32 %v1807_v43, %v777_v57  ;;  %vm2444_vm0 = vmor %vm885_vm3, %vm886_vm13  ;;  %v1624_v57 = vld [vmem:[%s2078_s21 + $0x8] sm:$0xff] }
 0x14b   : > { %v884_v0 = vadd.f32 %v2388_v34, %v883_v55  ;;  %v787_v4 = vor.u32 1.1754944e-38, %v786_v54  ;;  %vm785_vm1 = vcmp.eq.f32.partialorder %v784_v52, 8.507059e+37  ;;  %v957_v2 = vsub.f32 1.0, %v956_v60  ;;  %v1630_v52 = vld [vmem:[%s2078_s21 + $0x38] sm:$0xff]  ;;  %v1636_v60 = vld [vmem:[%s2609_s3 + $0x28] sm:$0xff] }
 0x14c   : > { %v779_v7 = vadd.f32 %v1807_v43, %v778_v63  ;;  %v721_v8 = vmax.f32 %v705_v59, 1.0  ;;  %v1811_v9 = vpop.eup %1810  ;;  %v908_v10 = vsel %vm905_vm14, %v907_v46, %v903_v62  ;;  %vm2448_vm2 = vcmp.eq.f32.partialorder %v889_v49, 8.507059e+37  ;;  %v1635_v59 = vld [vmem:[%s2609_s3 + $0x20] sm:$0xff]  ;;  %v1633_v62 = vld [vmem:[%s2609_s3 + $0x10] sm:$0xff]  ;;  %v1632_v63 = vld [vmem:[%s2609_s3 + $0x8] sm:$0xff] }
 0x14d   : > { %1194 = vrot.lane.b32.xlu1 %v1623_v38, %s1930_s0  ;;  %v892_v6 = vor.u32 1.1754944e-38, %v891_v58  ;;  %v761_v12 = vmul.f32 %v1811_v9, %v2392_v39  ;;  %vm765_vm4 = vweird.f32 %v2392_v39  ;;  %v888_v14 = vsel %vm2444_vm0, %v2388_v34, %v884_v0  ;;  %v1637_v58 = vld [vmem:[%s2609_s3 + $0x30] sm:$0xff]  ;;  %v1631_v0 = vld [vmem:[%s2609_s3] sm:$0xff] }
 0x14e   : > { %v783_v3 = vsel %vm2438_vm15, %v1807_v43, %v779_v7  ;;  %1814 = vrcp.f32 %v721_v8  ;;  %v769_v16 = vand.u32 2147483647, %v2392_v39  ;;  %v771_v17 = vand.u32 2147483648, %v2392_v39 }
 0x14f   : > { %1058 = vperm.xlu2 %1782, %v953_v51   ;;  %v788_v15 = vsel %vm785_vm1, %v787_v4, %v783_v3  ;;  %v958_v19 = vmul.f32 %v2421_v56, %v957_v2  ;;  %v762_v20 = vsub.f32 1.0, %v761_v12  ;;  %vm766_vm12 = vweird.f32 %v1811_v9  ;;  %v978_v2 = vld [vmem:[#allocation2 + $0x40] sm:$0xff] }
 0x150   : > { %v2457_v13 = vpop.eup %1812  ;;  %vm960_vm5 = vweird.f32 %v2358_v18  ;;  %vm961_vm6 = vweird.f32 %v2421_v56  ;;  %v966_v22 = vand.u32 2147483648, %v2358_v18  ;;  %v893_v24 = vsel %vm2448_vm2, %v892_v6, %v888_v14  ;;  %vm2475_vm7 = vmor %vm765_vm4, %vm766_vm12  ;;  %v971_v6 = vld [vmem:[#allocation2 + $0x8] sm:$0xff] }
 0x151   : > { %1206 = vrot.lane.b32.xlu0 %v1629_v61, %s1930_s0  ;;  %v821_v21 = vmul.f32 %v2457_v13, %v2400_v42  ;;  %v763_v23 = vmul.f32 %v1811_v9, %v762_v20  ;;  %v964_v25 = vand.u32 2147483647, %v2358_v18  ;;  %v772_v27 = vor.u32 1.1754944e-38, %v771_v17  ;;  %vm2480_vm3 = vmor %vm960_vm5, %vm961_vm6  ;;  %v1634_v61 = vld [vmem:[%s2609_s3 + $0x18] sm:$0xff]  ;;  %v983_v20 = vld [vmem:[#allocation2 + $0x68] sm:$0xff] }
 0x152   : > { %v959_v29 = vadd.f32 %v2421_v56, %v958_v19  ;;  %vm770_vm8 = vcmp.eq.f32.partialorder %v769_v16, 8.507059e+37  ;;  %v967_v18 = vor.u32 1.1754944e-38, %v966_v22  ;;  %vm840_vm9 = vweird.f32 %v721_v8  ;;  %v975_v22 = vld [vmem:[#allocation2 + $0x28] sm:$0xff] }
 0x153   : > { %v764_v30 = vadd.f32 %v1811_v9, %v763_v23  ;;  %v822_v31 = vsub.f32 1.0, %v821_v21  ;;  %v846_v35 = vand.u32 2147483648, %v721_v8  ;;  %v844_v40 = vand.u32 2147483647, %v721_v8 }
 0x154   : > { %v1815_v28 = vpop.eup %1814  ;;  %v963_v38 = vsel %vm2480_vm3, %v2421_v56, %v959_v29  ;;  %vm965_vm11 = vcmp.eq.f32.partialorder %v964_v25, 8.507059e+37  ;;  %vm825_vm13 = vweird.f32 %v2400_v42  ;;  %vm826_vm14 = vweird.f32 %v2457_v13 }
 0x155   : > { %1043 = vperm.xlu1 %1781, %v908_v10   ;;  %v836_v33 = vmul.f32 %v1815_v28, %v721_v8  ;;  %v768_v34 = vsel %vm2475_vm7, %v1811_v9, %v764_v30  ;;  %vm841_vm10 = vweird.f32 %v1815_v28  ;;  %v823_v41 = vmul.f32 %v2457_v13, %v822_v31  ;;  %vm827_vm1 = vmor %vm825_vm13, %vm826_vm14  ;;  %v979_v10 = vld [vmem:[#allocation2 + $0x48] sm:$0xff] }
 0x156   : > { %v773_v37 = vsel %vm770_vm8, %v772_v27, %v768_v34  ;;  %vm842_vm15 = vmor %vm840_vm9, %vm841_vm10  ;;  %v847_v44 = vor.u32 1.1754944e-38, %v846_v35  ;;  %v968_v45 = vsel %vm965_vm11, %v967_v18, %v963_v38  ;;  %v831_v46 = vand.u32 2147483648, %v2400_v42  ;;  %v974_v34 = vld [vmem:[#allocation2 + $0x20] sm:$0xff] }
 0x157   : > { %1003 = vperm.xlu2 %1782, %v788_v15   ;;  %v837_v39 = vsub.f32 1.0, %v836_v33  ;;  %vm845_vm0 = vcmp.eq.f32.partialorder %v844_v40, 8.507059e+37  ;;  %v824_v48 = vadd.f32 %v2457_v13, %v823_v41  ;;  %v829_v49 = vand.u32 2147483647, %v2400_v42  ;;  %v1638_v42 = vld [vmem:[%s2609_s3 + $0x38] sm:$0xff] }
 0x158   : > { %v832_v54 = vor.u32 1.1754944e-38, %v831_v46  ;;  %1665 = vmatpush.bf16.msra.mxu2 %v1638_v42  ;;  %1310 = vmatpush.bf16.msra.mxu0 %v1638_v42  ;;  %vm2671_vm4 = vcmask 523264  }
 0x159   : > { %1038 = vperm.xlu0 %1780, %v893_v24   ;;  %v838_v43 = vmul.f32 %v1815_v28, %v837_v39  ;;  %v828_v56 = vsel %vm827_vm1, %v2457_v13, %v824_v48  ;;  %vm830_vm2 = vcmp.eq.f32.partialorder %v829_v49, 8.507059e+37  ;;  %1664 = vmatpush.bf16.msra.mxu1 %v1638_v42  ;;  %vm2672_vm12 = vmmov %vm2671_vm4 }
 0x15a   : > { %v833_v55 = vsel %vm830_vm2, %v832_v54, %v828_v56  ;;  %1666 = vmatpush.bf16.msra.mxu3 %v1638_v42  ;;  %v981_v54 = vld [vmem:[#allocation2 + $0x58] sm:$0xff]  ;;  %vm2673_vm5 = vmmov %vm2671_vm4 }
 0x15b   : > { %v839_v47 = vadd.f32 %v1815_v28, %v838_v43  ;;  %vm2674_vm6 = vmmov %vm2671_vm4 }
 0x15c   : > { %1668 = vmatpush.bf16.msra.mxu2 %v1637_v58  ;;  %1311 = vmatpush.bf16.msra.mxu0 %v1637_v58  ;;  %vm2675_vm7 = vmmov %vm2671_vm4 }
 0x15d   : > { %998 = vperm.xlu1 %1781, %v773_v37   ;;  %v843_v50 = vsel %vm842_vm15, %v1815_v28, %v839_v47  ;;  %1667 = vmatpush.bf16.msra.mxu1 %v1637_v58  ;;  %vm2676_vm8 = vmmov %vm2671_vm4 }
 0x15e   : > { %v848_v51 = vsel %vm845_vm0, %v847_v44, %v843_v50  ;;  %1669 = vmatpush.bf16.msra.mxu3 %v1637_v58  ;;  %v980_v58 = vld [vmem:[#allocation2 + $0x50] sm:$0xff]  ;;  %vm2677_vm3 = vmmov %vm2671_vm4 }
 0x15f   : > { %1204 = vrot.lane.b32.xlu2 %v1628_v36, %s1930_s0  ;;  %vm2678_vm9 = vmmov %vm2677_vm3 }
 0x160   : > { %1671 = vmatpush.bf16.msra.mxu2 %v1636_v60  ;;  %1312 = vmatpush.bf16.msra.mxu0 %v1636_v60 }
 0x161   : > { %1063 = vperm.xlu0 %1780, %v968_v45   ;;  %1670 = vmatpush.bf16.msra.mxu1 %v1636_v60 }
 0x162   : > { %1672 = vmatpush.bf16.msra.mxu3 %v1636_v60 }
 0x164   : > { %1674 = vmatpush.bf16.msra.mxu2 %v1635_v59  ;;  %1313 = vmatpush.bf16.msra.mxu0 %v1635_v59 }
 0x165   : > { %1023 = vperm.xlu1 %1781, %v848_v51   ;;  %1673 = vmatpush.bf16.msra.mxu1 %v1635_v59 }
 0x166   : > { %1675 = vmatpush.bf16.msra.mxu3 %v1635_v59 }
 0x167   : > { %1200 = vrot.lane.b32.xlu2 %v1626_v53, %s1930_s0 }
 0x168   : > { %1677 = vmatpush.bf16.msra.mxu2 %v1634_v61  ;;  %1314 = vmatpush.bf16.msra.mxu0 %v1634_v61 }
 0x169   : > { %1018 = vperm.xlu0 %1780, %v833_v55   ;;  %1676 = vmatpush.bf16.msra.mxu1 %v1634_v61 }
 0x16a   : > { %1678 = vmatpush.bf16.msra.mxu3 %v1634_v61 }
 0x16c   : > { %1680 = vmatpush.bf16.msra.mxu2 %v1633_v62  ;;  %1315 = vmatpush.bf16.msra.mxu0 %v1633_v62 }
 0x16d   : > { %1196 = vrot.lane.b32.xlu1 %v1624_v57, %s1930_s0  ;;  %1679 = vmatpush.bf16.msra.mxu1 %v1633_v62 }
 0x16e   : > { %1681 = vmatpush.bf16.msra.mxu3 %v1633_v62  ;;  %v972_v62 = vld [vmem:[#allocation2 + $0x10] sm:$0xff] }
 0x170   : > { %1683 = vmatpush.bf16.msra.mxu2 %v1632_v63  ;;  %1316 = vmatpush.bf16.msra.mxu0 %v1632_v63 }
 0x171   : > { %1208 = vrot.lane.b32.xlu0 %v1630_v52, %s1930_s0  ;;  %1682 = vmatpush.bf16.msra.mxu1 %v1632_v63 }
 0x172   : > { %1684 = vmatpush.bf16.msra.mxu3 %v1632_v63 }
 0x174   : > { %1686 = vmatpush.bf16.msra.mxu2 %v1631_v0  ;;  %1317 = vmatpush.bf16.msra.mxu0 %v1631_v0 }
 0x175   : > { %1685 = vmatpush.bf16.msra.mxu1 %v1631_v0 }
 0x176   : > { %1687 = vmatpush.bf16.msra.mxu3 %v1631_v0 }
 0x17c   : > { %v1203_v1 = vpop.permute.xlu2 %1202 }
 0x191   : > { %v989_v4 = vpop.permute.xlu2 %988 }
 0x192   : > { %v1066_v15 = vmul.f32 %v989_v4, %v970_v11  ;;  %v973_v4 = vld [vmem:[#allocation2 + $0x18] sm:$0xff] }
 0x194   : > { %v1082_v23 = vpack.c.bf16 %v1066_v15, %v1066_v15 }
 0x196   : > { %v1130_v32 = vunpack.c.l.b16 %v1082_v23 }
 0x199   : > { %v994_v8 = vpop.permute.xlu2 %993 }
 0x19a   : > { %v1067_v16 = vmul.f32 %v994_v8, %v971_v6  ;;  %v977_v6 = vld [vmem:[#allocation2 + $0x38] sm:$0xff] }
 0x19c   : > { %v1083_v24 = vpack.c.bf16 %v1067_v16, %v1067_v16 }
 0x19e   : > { %v1131_v33 = vunpack.c.l.b16 %v1083_v24 }
 0x1a0   : > { %v1146_v38 = vpack.c.b16 %v1131_v33, %v1130_v32 }
 0x1a1   : > { %v1199_v25 = vpop.permute.xlu2 %1198 }
 0x1a7   : > { %v1049_v5 = vpop.permute.xlu1 %1048 }
 0x1a8   : > { %v1029_v7 = vpop.permute.xlu0 %1028  ;;  %v1078_v18 = vmul.f32 %v1049_v5, %v982_v26 }
 0x1a9   : > { %v1074_v9 = vmul.f32 %v1029_v7, %v978_v2  ;;  %v1059_v47 = vpop.permute.xlu2 %1058 }
 0x1aa   : > { %v1094_v39 = vpack.c.bf16 %v1078_v18, %v1078_v18 }
 0x1ab   : > { %v1090_v13 = vpack.c.bf16 %v1074_v9, %v1074_v9 }
 0x1ac   : > { %v1142_v48 = vunpack.c.l.b16 %v1094_v39 }
 0x1ad   : > { %v1138_v19 = vunpack.c.l.b16 %v1090_v13  ;;  %v984_v13 = vld [vmem:[#allocation2 + $0x70] sm:$0xff] }
 0x1af   : > { %v1054_v3 = vpop.permute.xlu1 %1053 }
 0x1b0   : > { %v1034_v12 = vpop.permute.xlu0 %1033  ;;  %v1079_v29 = vmul.f32 %v1054_v3, %v983_v20 }
 0x1b1   : > { %v1075_v14 = vmul.f32 %v1034_v12, %v979_v10  ;;  %v1004_v42 = vpop.permute.xlu2 %1003  ;;  %v985_v10 = vld [vmem:[#allocation2 + $0x78] sm:$0xff] }
 0x1b2   : > { %v1095_v35 = vpack.c.bf16 %v1079_v29, %v1079_v29  ;;  %v1069_v8 = vmul.f32 %v1004_v42, %v973_v4 }
 0x1b3   : > { %v1091_v17 = vpack.c.bf16 %v1075_v14, %v1075_v14 }
 0x1b4   : > { %v1143_v43 = vunpack.c.l.b16 %v1095_v35  ;;  %v1085_v15 = vpack.c.bf16 %v1069_v8, %v1069_v8 }
 0x1b5   : > { %v1139_v21 = vunpack.c.l.b16 %v1091_v17 }
 0x1b6   : > { %v1152_v51 = vpack.c.b16 %v1143_v43, %v1142_v48 }
 0x1b7   : > { %v1014_v27 = vpop.permute.xlu1 %1013  ;;  %v1150_v28 = vpack.c.b16 %v1139_v21, %v1138_v19  ;;  %v1080_v19 = vmul.f32 %v1059_v47, %v984_v13  ;;  %v976_v21 = vld [vmem:[#allocation2 + $0x30] sm:$0xff] }
 0x1b8   : > { %v1071_v30 = vmul.f32 %v1014_v27, %v975_v22  ;;  %v1133_v22 = vunpack.c.l.b16 %v1085_v15 }
 0x1b9   : > { %v1228_v31 = vsel %vm2671_vm4, %v1150_v28, %v1203_v1  ;;  %v1205_v2 = vpop.permute.xlu2 %1204  ;;  %v1096_v26 = vpack.c.bf16 %v1080_v19, %v1080_v19 }
 0x1ba   : > { %1338 = vmatmul.bf16.vlgmr.msra.gmra.mxu2 %v1228_v31  ;;  %v1087_v36 = vpack.c.bf16 %v1071_v30, %v1071_v30 }
 0x1bb   : > { %v1009_v37 = vpop.permute.xlu0 %1008  ;;  %v1144_v18 = vunpack.c.l.b16 %v1096_v26 }
 0x1bc   : > { %v1070_v40 = vmul.f32 %v1009_v37, %v974_v34  ;;  %v1135_v44 = vunpack.c.l.b16 %v1087_v36 }
 0x1be   : > { %v1086_v45 = vpack.c.bf16 %v1070_v40, %v1070_v40 }
 0x1bf   : > { %v1195_v41 = vpop.permute.xlu1 %1194 }
 0x1c0   : > { %v1212_v46 = vsel %vm2672_vm12, %v1146_v38, %v1195_v41  ;;  %v1134_v49 = vunpack.c.l.b16 %v1086_v45  ;;  %v1783_v41 = vld [vmem:[%s2610_s4] ss:$0 sm:$0xff] }
 0x1c1   : > { %1318 = vmatmul.bf16.vlgmr.msra.gmra.mxu0 %v1212_v46  ;;  %v1201_v35 = vpop.permute.xlu2 %1200 }
 0x1c2   : > { %v1148_v50 = vpack.c.b16 %v1135_v44, %v1134_v49 }
 0x1c3   : > { %v1207_v53 = vpop.permute.xlu0 %1206 }
 0x1c4   : > { %v1220_v56 = vsel %vm2673_vm5, %v1148_v50, %v1199_v25  ;;  %v1236_v55 = vsel %vm2674_vm6, %v1152_v51, %v1207_v53 }
 0x1c5   : > { %1328 = vmatmul.bf16.vlgmr.msra.gmra.mxu1 %v1220_v56  ;;  %1348 = vmatmul.bf16.vlgmr.msra.gmra.mxu3 %v1236_v55 }
 0x1c7   : > { %v1044_v57 = vpop.permute.xlu1 %1043 }
 0x1c8   : > { %v1077_v52 = vmul.f32 %v1044_v57, %v981_v54 }
 0x1ca   : > { %v1093_v60 = vpack.c.bf16 %v1077_v52, %v1077_v52 }
 0x1cb   : > { %v1039_v59 = vpop.permute.xlu0 %1038 }
 0x1cc   : > { %v1076_v61 = vmul.f32 %v1039_v59, %v980_v58  ;;  %v1141_v0 = vunpack.c.l.b16 %v1093_v60 }
 0x1ce   : > { %v1092_v1 = vpack.c.bf16 %v1076_v61, %v1076_v61 }
 0x1cf   : > { %v999_v63 = vpop.permute.xlu1 %998 }
 0x1d0   : > { %v1140_v5 = vunpack.c.l.b16 %v1092_v1  ;;  %v1068_v7 = vmul.f32 %v999_v63, %v972_v62 }
 0x1d2   : > { %v1151_v9 = vpack.c.b16 %v1141_v0, %v1140_v5  ;;  %v1084_v3 = vpack.c.bf16 %v1068_v7, %v1068_v7 }
 0x1d3   : > { %v1064_v11 = vpop.permute.xlu0 %1063 }
 0x1d4   : > { %v1232_v12 = vsel %vm2675_vm7, %v1151_v9, %v1205_v2  ;;  %v1081_v16 = vmul.f32 %v1064_v11, %v985_v10  ;;  %v1132_v20 = vunpack.c.l.b16 %v1084_v3 }
 0x1d5   : > { %1343 = vmatmul.bf16.gmra.mxu2 %v1232_v12 }
 0x1d6   : > { %v1097_v23 = vpack.c.bf16 %v1081_v16, %v1081_v16  ;;  %v1147_v28 = vpack.c.b16 %v1133_v22, %v1132_v20 }
 0x1d7   : > { %v1024_v14 = vpop.permute.xlu1 %1023 }
 0x1d8   : > { %v1073_v17 = vmul.f32 %v1024_v14, %v977_v6  ;;  %v1145_v30 = vunpack.c.l.b16 %v1097_v23 }
 0x1da   : > { %v1089_v24 = vpack.c.bf16 %v1073_v17, %v1073_v17  ;;  %v1153_v37 = vpack.c.b16 %v1145_v30, %v1144_v18 }
 0x1db   : > { %v1019_v25 = vpop.permute.xlu0 %1018 }
 0x1dc   : > { %v1072_v27 = vmul.f32 %v1019_v25, %v976_v21  ;;  %v1137_v32 = vunpack.c.l.b16 %v1089_v24 }
 0x1de   : > { %v1088_v31 = vpack.c.bf16 %v1072_v27, %v1072_v27 }
 0x1df   : > { %v1197_v29 = vpop.permute.xlu1 %1196 }
 0x1e0   : > { %v1216_v33 = vsel %vm2676_vm8, %v1147_v28, %v1197_v29  ;;  %v1136_v34 = vunpack.c.l.b16 %v1088_v31 }
 0x1e1   : > { %1323 = vmatmul.bf16.gmra.mxu0 %v1216_v33 }
 0x1e2   : > { %v1149_v36 = vpack.c.b16 %v1137_v32, %v1136_v34 }
 0x1e3   : > { %v1209_v39 = vpop.permute.xlu0 %1208 }
 0x1e4   : > { %v1224_v40 = vsel %vm2677_vm3, %v1149_v36, %v1201_v35  ;;  %v1240_v38 = vsel %vm2678_vm9, %v1153_v37, %v1209_v39 }
 0x1e5   : > { %1333 = vmatmul.bf16.gmra.mxu1 %v1224_v40  ;;  %1353 = vmatmul.bf16.gmra.mxu3 %v1240_v38 }
 0x23d   : > { %v1339_v43 = vpop.f32.mrf.mxu2 }
 0x23e   : > { %v1340_v44 = vadd.f32 %v1783_v41, %v1339_v43  ;;  %v1319_v45 = vpop.f32.mrf.mxu0 }
 0x23f   : > { %v1320_v46 = vadd.f32 %v1783_v41, %v1319_v45 }
 0x240   : > { %1367 = vst [vmem:[%s2082_s9 + $0x40] sm:$0xff] %v1340_v44 }
 0x241   : > { %1359 = vst [vmem:[%s2082_s9] sm:$0xff] %v1320_v46 }
 0x242   : > { %v1329_v47 = vpop.f32.mrf.mxu1 }
 0x243   : > { %v1330_v48 = vadd.f32 %v1783_v41, %v1329_v47 }
 0x245   : > { %v1341_v49 = vpop.f32.mrf.mxu2  ;;  %1363 = vst [vmem:[%s2082_s9 + $0x20] sm:$0xff] %v1330_v48 }
 0x246   : > { %v1342_v50 = vadd.f32 %v1783_v41, %v1341_v49  ;;  %v1321_v51 = vpop.f32.mrf.mxu0 }
 0x247   : > { %v1322_v53 = vadd.f32 %v1783_v41, %v1321_v51 }
 0x248   : > { %1368 = vst [vmem:[%s2082_s9 + $0x48] sm:$0xff] %v1342_v50  ;;  %v1349_v54 = vpop.f32.mrf.mxu3 }
 0x249   : > { %1360 = vst [vmem:[%s2082_s9 + $0x8] sm:$0xff] %v1322_v53  ;;  %v1350_v56 = vadd.f32 %v1783_v41, %v1349_v54 }
 0x24a   : > { %v1331_v55 = vpop.f32.mrf.mxu1 }
 0x24b   : > { %1371 = vst [vmem:[%s2082_s9 + $0x60] sm:$0xff] %v1350_v56  ;;  %v1332_v57 = vadd.f32 %v1783_v41, %v1331_v55 }
 0x24d   : > { %1364 = vst [vmem:[%s2082_s9 + $0x28] sm:$0xff] %v1332_v57 }
 0x250   : > { %v1351_v52 = vpop.f32.mrf.mxu3 }
 0x251   : > { %v1352_v42 = vadd.f32 %v1783_v41, %v1351_v52 }
 0x253   : > { %1372 = vst [vmem:[%s2082_s9 + $0x68] sm:$0xff] %v1352_v42 }
 0x258   : > { %v1344_v58 = vpop.f32.mrf.mxu2 }
 0x259   : > { %v1345_v60 = vadd.f32 %v1783_v41, %v1344_v58 }
 0x25b   : > { %1369 = vst [vmem:[%s2082_s9 + $0x50] sm:$0xff] %v1345_v60 }
 0x25e   : > { %v1324_v59 = vpop.f32.mrf.mxu0 }
 0x25f   : > { %v1325_v61 = vadd.f32 %v1783_v41, %v1324_v59 }
 0x260   : > { %v1346_v62 = vpop.f32.mrf.mxu2 }
 0x261   : > { %1361 = vst [vmem:[%s2082_s9 + $0x10] sm:$0xff] %v1325_v61  ;;  %v1347_v63 = vadd.f32 %v1783_v41, %v1346_v62 }
 0x262   : > { %v1334_v0 = vpop.f32.mrf.mxu1 }
 0x263   : > { %1370 = vst [vmem:[%s2082_s9 + $0x58] sm:$0xff] %v1347_v63  ;;  %v1335_v1 = vadd.f32 %v1783_v41, %v1334_v0 }
 0x265   : > { %1365 = vst [vmem:[%s2082_s9 + $0x30] sm:$0xff] %v1335_v1 }
 0x266   : > { %v1326_v4 = vpop.f32.mrf.mxu0 }
 0x267   : > { %v1327_v5 = vadd.f32 %v1783_v41, %v1326_v4 }
 0x268   : > { %v1354_v7 = vpop.f32.mrf.mxu3 }
 0x269   : > { %1362 = vst [vmem:[%s2082_s9 + $0x18] sm:$0xff] %v1327_v5  ;;  %v1355_v2 = vadd.f32 %v1783_v41, %v1354_v7 }
 0x26a   : > { %v1336_v8 = vpop.f32.mrf.mxu1 }
 0x26b   : > { %1373 = vst [vmem:[%s2082_s9 + $0x70] sm:$0xff] %v1355_v2  ;;  %v1337_v9 = vadd.f32 %v1783_v41, %v1336_v8 }
 0x26d   : > { %1366 = vst [vmem:[%s2082_s9 + $0x38] sm:$0xff] %v1337_v9 }
 0x270   : > { %v1356_v10 = vpop.f32.mrf.mxu3 }
 0x271   : > { %v1357_v11 = vadd.f32 %v1783_v41, %v1356_v10 }
 0x273   : > { %1374 = vst [vmem:[%s2082_s9 + $0x78] sm:$0xff] %v1357_v11 }
 0x274 PF: > { %s1639_s28 = sshll.u32 %s1914_s24, 7  ;;  %s1388_s13 = sshll.u32 %s2082_s9, 4  ;;  %s1389_s13 = int_to_ptr.vmem [resolvable:$true] %s1388_s13 }
 0x275   : > { %s1387_s12 = scalar_lea.hbm %s2611_s5, %s1639_s28  ;;  %s2679_s7 = sand.u32 1, %s1894_s19  }
 0x276   : > { %s1390_s10 = sshll.u32 %s1387_s12, 4  ;;  %s1376_s21 = scalar_lea.sflag [#allocation6], %s2679_s7  ;;  %s1391_s10 = int_to_ptr.hbm [resolvable:$true] %s1390_s10 }
 0x277   : > { %s1830_s6 = sshra.s32 %s1391_s10, 4  ;;  %s1836_s24 = scalar_lea.hbm %s2611_s5, 256  ;;  %s1831_s6 = int_to_ptr.hbm [resolvable:$true] %s1830_s6 }
 0x278   : > { %s1832_s0 = scalar_lea.hbm %s1831_s6, 128  ;;  %p1837_p11 = scmp.lt.s32.totalorder %s1831_s6, %s2611_s5 }
 0x279   : > { %p1833_p8 = scmp.ne.s32.totalorder %s1831_s6, %s1832_s0  ;;  %p1838_p13 = scmp.lt.s32.totalorder %s1836_s24, %s1832_s0 }
 0x27b   : > { %p1834_p9 = pnand %p1833_p8, %p2035_p7  ;;  %p1839_p0 = por %p1838_p13, %p1837_p11 }
 0x27d   : > { %p1835_p10 = pneg %p1834_p9 }
 0x27f   : > { %p1840_p1 = pnand %p1839_p0, %p1835_p10 }
 0x281   : > { %1843 = shalt.err (!%p1840_p1)
}
 0x282   : > { %s1931_s9 = smov 128   ;;  %s1932_s28 = smov 8  }
 0x283   : > { %1688 = dma.vmem_to_hbm [thread:$0]  (%p2035_p7), %s1389_s13, 2048, %s1391_s10, %s1376_s21, %s1931_s9, %s1931_s9, %s1932_s28  }
 0x284 PF: > { %p1694_p2 = scmp.ge.s32.totalorder %s1926_s27, 2  ;;  %s1405_s29 = sand.u32 1, %s1890_s18  }
 0x285   : > { %s1406_s8 = scalar_lea.sflag [#allocation6], %s1405_s29 }
 0x286   : > { %p1691_p3 = pnand %p1694_p2, %p2043_p12 }
 0x288   : > { %p1692_p4 = pneg %p1691_p3 }
 0x28a   : > { %1885 = dma.done.wait (%p1692_p4), %s1406_s8, 2048  }
 0x28b   : > { %1887 = vsyncadd (%p1692_p4), %s1406_s8, 4294965248  ;;  %s18_s27 = sadd.s32 1, %s1926_s27   ;;  %s2680_s24 = sld [smem:[#allocation8_spill]] }
 0x28c   : > { %p15_p5 = scmp.ge.s32.totalorder %s18_s27, 6   ;;  %s2681_s11 = sld [smem:[#allocation9_spill]] }
 0x28d   : > { %s2682_s26 = sld [smem:[#allocation10_spill]]  ;;  %s2683_s18 = smov %s1894_s19 }
 0x28e   : > { %s2684_s19 = smov %s1898_s20  ;;  %s2685_s20 = smov %s2048_s15 }
 0x28f   : > { %s2686_s21 = smov %s1906_s22  ;;  %s2687_s22 = smov %s2051_s16 }
 0x290   : > { %s2688_s23 = smov %s1918_s25  ;;  %17 = sbr.rel (!%p15_p5) target bundleno = 8 (0x8), region = 132 }
 0x292   : > { %s2689_s25 = smov %s2681_s11 }
 0x295   :  { %1412 = vsyncpa [#allocation6], 1 }
 0x296   :  { %1414 = vsyncpa [#allocation6 + $0x1], 1 }

</bundles_post_ra>
